<compile_context>
chip_gen: v6e
topology: v6e:2x2x1
jax: 0.10.0
libtpu: 0.0.40
codegen_flags: <defaults>
</compile_context>

<pallas_src>
import jax
import jax.numpy as jnp
from jax.experimental import pallas as pl
from jax.experimental.pallas import tpu as pltpu


# ----------------------------- parameter / glue helpers -----------------------------

def _toeplitz(fil, out_len, in_len):
    """M[y, y+k] = fil[k] — valid cross-correlation as a matrix [out_len, in_len]."""
    L = fil.shape[0]
    rows = jnp.arange(out_len)[:, None]
    cols = jnp.arange(in_len)[None, :]
    k = cols - rows
    valid = (k >= 0) & (k < L)
    return jnp.where(valid, fil[jnp.clip(k, 0, L - 1)], 0.0).astype(jnp.float32)


def _nearest_mat(in_len, out_len):
    """G[i, floor(i*in/out)] = 1 — PyTorch 'nearest' interpolate as a gather matrix."""
    idx = (jnp.arange(out_len) * in_len) // out_len
    return jax.nn.one_hot(idx, in_len, dtype=jnp.float32)  # [out_len, in_len]


def _rec_filters(dec_lo):
    """Reproduce the torch module's filter construction exactly."""
    lo = jnp.reshape(dec_lo, (-1,)).astype(jnp.float32)
    hi = lo[::-1]
    hi = hi.at[::2].multiply(-1.0)
    hi = hi - jnp.mean(hi)
    return lo, hi


def _vmem_capacity_bytes():
    """Best-effort physical VMEM query (v5e/v6e: 128 MiB, v7x: 64 MiB)."""
    try:
        info = pltpu.get_tpu_info()
        for name in ("vmem_capacity_bytes", "vmem_size_bytes", "vmem_bytes"):
            v = getattr(info, name, None)
            if v:
                return int(v)
    except Exception:
        pass
    return 64 << 20  # conservative fallback


# ----------------------------------- Pallas kernel ----------------------------------

def _idwt_kernel(xll_ref, xlh_ref, xhl_ref, xhh_ref, w_ref, out_ref):
    # x*_ref : (TN, K)          flattened subbands, native dtype (K = H*W)
    # w_ref  : (4, K, NO_pad)   per-subband Kron weight slabs, f32, lane-padded
    # out_ref: (TN, NO_pad)     lane-dense flat output (NO_pad multiple of 128)
    acc = jnp.dot(xll_ref[...], w_ref[0], preferred_element_type=jnp.float32)
    acc = acc + jnp.dot(xlh_ref[...], w_ref[1], preferred_element_type=jnp.float32)
    acc = acc + jnp.dot(xhl_ref[...], w_ref[2], preferred_element_type=jnp.float32)
    acc = acc + jnp.dot(xhh_ref[...], w_ref[3], preferred_element_type=jnp.float32)
    out_ref[...] = acc.astype(out_ref.dtype)


# ------------------------------------- wrapper ---------------------------------------

def idwt_1lvl(x_dwt, dec_lo):
    x_ll, (x_lh, x_hl, x_hh) = x_dwt
    b, c, h, w = x_ll.shape
    L = int(dec_lo.shape[0])

    lo, hi = _rec_filters(dec_lo)
    hu, wu = 2 * h + 1, 2 * w + 1          # nearest-upsampled size
    ho, wo = hu - L + 1, wu - L + 1        # valid-conv output size

    # fold (nearest upsample -> separable correlation) into small per-axis matrices
    gh = _nearest_mat(h, hu)               # [hu, h]
    gw = _nearest_mat(w, wu)               # [wu, w]
    r_lo = _toeplitz(lo, ho, hu) @ gh      # [ho, h]   rows filtered with lo
    r_hi = _toeplitz(hi, ho, hu) @ gh      # [ho, h]   rows filtered with hi
    c_lo = _toeplitz(lo, wo, wu) @ gw      # [wo, w]   cols filtered with lo
    c_hi = _toeplitz(hi, wo, wu) @ gw      # [wo, w]   cols filtered with hi

    K = h * w                               # contraction depth per subband
    NO = ho * wo                            # flat output length
    NO_pad = ((NO + 127) // 128) * 128      # lane-dense output width

    def kron_slab(r_mat, c_mat):
        # W[(i,j), (y,x)] = R[y,i] * C[x,j]
        t = jnp.einsum('yi,xj->ijyx', r_mat, c_mat)     # (h, w, ho, wo)
        return t.reshape(K, NO)

    # subband -> (row filter, col filter):  ll:(lo,lo)  lh:(hi,lo)  hl:(lo,hi)  hh:(hi,hi)
    w_all = jnp.stack([kron_slab(r_lo, c_lo), kron_slab(r_hi, c_lo),
                       kron_slab(r_lo, c_hi), kron_slab(r_hi, c_hi)], axis=0)
    w_all = jnp.pad(w_all, ((0, 0), (0, 0), (0, NO_pad - NO)))   # (4, K, NO_pad) f32

    n = b * c
    in_dtype = x_ll.dtype
    out_dtype = in_dtype
    in_itemsize = jnp.dtype(in_dtype).itemsize
    out_itemsize = jnp.dtype(out_dtype).itemsize

    # ---------------- chip-aware block sizing (include in-kernel intermediates) ------
    vmem_cap = _vmem_capacity_bytes()
    n_cores = 2 if vmem_cap <= (96 << 20) else 1          # 64 MiB/TC => v7x (2 TCs)
    vmem_limit = min(vmem_cap * 3 // 4, 96 << 20)          # v7x: 48 MiB, v5e/v6e: 96 MiB

    weight_bytes = 2 * int(w_all.size) * 4                 # weights (double-buffer safe)
    per_sample = (2 * (4 * K * in_itemsize + NO_pad * out_itemsize)  # dbl-buffered I/O
                  + 2 * NO_pad * 4)                                  # f32 acc + cast temp
    budget = int(vmem_limit * 0.6)                         # leave headroom
    tn = max(1, (budget - weight_bytes) // per_sample)
    tn = min(tn, n)
    if n_cores >= 2:
        # v7x: >= 2 grid steps per TensorCore so input/output DMA overlaps compute.
        tn = min(tn, max(1, -(-n // (2 * n_cores))))
    tn = max(8, (tn // 8) * 8)                             # sublane-aligned block rows
    n_pad = -(-n // tn) * tn
    grid = (n_pad // tn,)

    def flat(xs):
        xf = xs.reshape(n, K)                              # contiguous reshape (no copy)
        if n_pad != n:
            xf = jnp.pad(xf, ((0, n_pad - n), (0, 0)))
        return xf

    xll_f, xlh_f, xhl_f, xhh_f = flat(x_ll), flat(x_lh), flat(x_hl), flat(x_hh)

    flops = 2 * n_pad * 4 * K * NO_pad
    bytes_accessed = (4 * n_pad * K * in_itemsize
                      + int(w_all.size) * 4
                      + n_pad * NO_pad * out_itemsize)

    x_spec = pl.BlockSpec((tn, K), lambda i: (i, 0))
    out = pl.pallas_call(
        _idwt_kernel,
        out_shape=jax.ShapeDtypeStruct((n_pad, NO_pad), out_dtype),
        grid_spec=pltpu.PrefetchScalarGridSpec(
            num_scalar_prefetch=0,
            grid=grid,
            in_specs=[x_spec, x_spec, x_spec, x_spec,
                      pl.BlockSpec((4, K, NO_pad), lambda i: (0, 0, 0))],  # weights once
            out_specs=pl.BlockSpec((tn, NO_pad), lambda i: (i, 0)),
        ),
        compiler_params=pltpu.CompilerParams(
            dimension_semantics=("parallel",),
            vmem_limit_bytes=int(vmem_limit),
        ),
        cost_estimate=pl.CostEstimate(
            flops=int(flops), transcendentals=0, bytes_accessed=int(bytes_accessed)),
    )(xll_f, xlh_f, xhl_f, xhh_f, w_all)

    # strip sample / lane padding (now only ~14% of the output), restore NCHW
    return out[:n, :NO].reshape(b, c, ho, wo)


# ------------------------------ pure-JAX reference ----------------------------------

def idwt_1lvl_ref(x_dwt, dec_lo):
    x_ll, (x_lh, x_hl, x_hh) = x_dwt
    b, c, h, w = x_ll.shape
    lo, hi = _rec_filters(dec_lo)
    f_ll = jnp.outer(lo, lo)
    f_lh = jnp.outer(hi, lo)
    f_hl = jnp.outer(lo, hi)
    f_hh = jnp.outer(hi, hi)
    K = jnp.stack([f_ll, f_lh, f_hl, f_hh], 0)               # [4, L, L]
    K = jnp.tile(K[None], (c, 1, 1, 1))                      # [c, 4, L, L] (OIHW)
    x_comb = jnp.stack([x_ll, x_lh, x_hl, x_hh], axis=2).reshape(b, c * 4, h, w)
    hu, wu = 2 * h + 1, 2 * w + 1
    ih = (jnp.arange(hu) * h) // hu
    iw = (jnp.arange(wu) * w) // wu
    up = x_comb[:, :, ih, :][:, :, :, iw].astype(jnp.float32)
    return jax.lax.conv_general_dilated(
        up, K, window_strides=(1, 1), padding='VALID',
        dimension_numbers=('NCHW', 'OIHW', 'NCHW'),
        feature_group_count=c)


# ---------------------------------------- main ---------------------------------------

if __name__ == "__main__":
    key = jax.random.PRNGKey(0)
    kf, kll, klh, khl, khh = jax.random.split(key, 5)

    # deterministic synthetic filter, same construction as the module's __init__
    FIL_LEN = 8
    dec_lo = jax.random.uniform(kf, (FIL_LEN,), dtype=jnp.float32) - 0.5
    dec_lo = dec_lo / jnp.linalg.norm(dec_lo)
    # NOTE: pad_mode='replicate' is stored by the module but never used in forward.
    # TODO(synk): the module's debug print() calls are host-side only and are omitted.

    b, c, h, w = 2, 4, 16, 16
    x_ll = jax.random.normal(kll, (b, c, h, w), dtype=jnp.float32)
    x_lh = jax.random.normal(klh, (b, c, h, w), dtype=jnp.float32)
    x_hl = jax.random.normal(khl, (b, c, h, w), dtype=jnp.float32)
    x_hh = jax.random.normal(khh, (b, c, h, w), dtype=jnp.float32)
    x_dwt = (x_ll, (x_lh, x_hl, x_hh))

    out = idwt_1lvl(x_dwt, dec_lo)
    out = jax.block_until_ready(out)

    ref = idwt_1lvl_ref(x_dwt, dec_lo)
    assert out.shape == ref.shape, (out.shape, ref.shape)
    max_err = float(jnp.max(jnp.abs(out - ref)))
    assert jnp.allclose(out, ref, rtol=1e-4, atol=1e-4), max_err

    print("KERNEL_OK")
</pallas_src>

<mosaic_0001>
module attributes {stable_mosaic.version = 11 : i64} {
  func.func @_idwt_kernel(%arg0: i32, %arg1: memref<8x256xf32, #tpu.memory_space<vmem>>, %arg2: memref<8x256xf32, #tpu.memory_space<vmem>>, %arg3: memref<8x256xf32, #tpu.memory_space<vmem>>, %arg4: memref<8x256xf32, #tpu.memory_space<vmem>>, %arg5: memref<4x256x768xf32, #tpu.memory_space<vmem>>, %arg6: memref<8x768xf32, #tpu.memory_space<vmem>>) attributes {dimension_semantics = [#tpu.dimension_semantics<parallel>], iteration_bounds = array<i64: 1>, scalar_prefetch = 0 : i64, scratch_operands = 0 : i64, tpu.core_type = #tpu.core_type<tc>, window_params = [{transform_indices = @transform_0, window_bounds = array<i64: 8, 256>}, {transform_indices = @transform_1, window_bounds = array<i64: 8, 256>}, {transform_indices = @transform_2, window_bounds = array<i64: 8, 256>}, {transform_indices = @transform_3, window_bounds = array<i64: 8, 256>}, {pipeline_mode = #tpu.pipeline_mode<synchronous>, transform_indices = @transform_4, window_bounds = array<i64: 4, 256, 768>}, {transform_indices = @transform_5, window_bounds = array<i64: 8, 768>}]} {
    %c0 = arith.constant 0 : index
    %c0_0 = arith.constant 0 : index
    %0 = vector.load %arg1[%c0, %c0_0] : memref<8x256xf32, #tpu.memory_space<vmem>>, vector<8x256xf32>
    %c0_1 = arith.constant 0 : index
    %c0_2 = arith.constant 0 : index
    %c0_3 = arith.constant 0 : index
    %1 = vector.load %arg5[%c0_1, %c0_2, %c0_3] : memref<4x256x768xf32, #tpu.memory_space<vmem>>, vector<1x256x768xf32>
    %2 = vector.shape_cast %1 : vector<1x256x768xf32> to vector<256x768xf32>
    %cst = arith.constant dense<0.000000e+00> : vector<8x768xf32>
    %3 = tpu.matmul %0, %2, %cst {dimension_numbers = #tpu.dot_dimension_numbers<[1], [0], [0], [1], [0, 0, 1, 1], [], []>} : vector<8x256xf32>, vector<256x768xf32>, vector<8x768xf32> -> vector<8x768xf32>
    %c0_4 = arith.constant 0 : index
    %c0_5 = arith.constant 0 : index
    %4 = vector.load %arg2[%c0_4, %c0_5] : memref<8x256xf32, #tpu.memory_space<vmem>>, vector<8x256xf32>
    %c1 = arith.constant 1 : index
    %c0_6 = arith.constant 0 : index
    %c0_7 = arith.constant 0 : index
    %5 = vector.load %arg5[%c1, %c0_6, %c0_7] : memref<4x256x768xf32, #tpu.memory_space<vmem>>, vector<1x256x768xf32>
    %6 = vector.shape_cast %5 : vector<1x256x768xf32> to vector<256x768xf32>
    %cst_8 = arith.constant dense<0.000000e+00> : vector<8x768xf32>
    %7 = tpu.matmul %4, %6, %cst_8 {dimension_numbers = #tpu.dot_dimension_numbers<[1], [0], [0], [1], [0, 0, 1, 1], [], []>} : vector<8x256xf32>, vector<256x768xf32>, vector<8x768xf32> -> vector<8x768xf32>
    %8 = arith.addf %3, %7 : vector<8x768xf32>
    %c0_9 = arith.constant 0 : index
    %c0_10 = arith.constant 0 : index
    %9 = vector.load %arg3[%c0_9, %c0_10] : memref<8x256xf32, #tpu.memory_space<vmem>>, vector<8x256xf32>
    %c2 = arith.constant 2 : index
    %c0_11 = arith.constant 0 : index
    %c0_12 = arith.constant 0 : index
    %10 = vector.load %arg5[%c2, %c0_11, %c0_12] : memref<4x256x768xf32, #tpu.memory_space<vmem>>, vector<1x256x768xf32>
    %11 = vector.shape_cast %10 : vector<1x256x768xf32> to vector<256x768xf32>
    %cst_13 = arith.constant dense<0.000000e+00> : vector<8x768xf32>
    %12 = tpu.matmul %9, %11, %cst_13 {dimension_numbers = #tpu.dot_dimension_numbers<[1], [0], [0], [1], [0, 0, 1, 1], [], []>} : vector<8x256xf32>, vector<256x768xf32>, vector<8x768xf32> -> vector<8x768xf32>
    %13 = arith.addf %8, %12 : vector<8x768xf32>
    %c0_14 = arith.constant 0 : index
    %c0_15 = arith.constant 0 : index
    %14 = vector.load %arg4[%c0_14, %c0_15] : memref<8x256xf32, #tpu.memory_space<vmem>>, vector<8x256xf32>
    %c3 = arith.constant 3 : index
    %c0_16 = arith.constant 0 : index
    %c0_17 = arith.constant 0 : index
    %15 = vector.load %arg5[%c3, %c0_16, %c0_17] : memref<4x256x768xf32, #tpu.memory_space<vmem>>, vector<1x256x768xf32>
    %16 = vector.shape_cast %15 : vector<1x256x768xf32> to vector<256x768xf32>
    %cst_18 = arith.constant dense<0.000000e+00> : vector<8x768xf32>
    %17 = tpu.matmul %14, %16, %cst_18 {dimension_numbers = #tpu.dot_dimension_numbers<[1], [0], [0], [1], [0, 0, 1, 1], [], []>} : vector<8x256xf32>, vector<256x768xf32>, vector<8x768xf32> -> vector<8x768xf32>
    %18 = arith.addf %13, %17 : vector<8x768xf32>
    %c0_19 = arith.constant 0 : index
    %c0_20 = arith.constant 0 : index
    %19 = vector.load %arg6[%c0_19, %c0_20] : memref<8x768xf32, #tpu.memory_space<vmem>>, vector<8x768xf32>
    tpu.vector_store %arg6[%c0_19, %c0_20], %18 {strides = array<i32>} : memref<8x768xf32, #tpu.memory_space<vmem>>, vector<8x768xf32>,
    return
  }
  func.func @transform_0(%arg0: i32) -> (i32, i32) {
    %c0_i32 = arith.constant 0 : i32
    %c0_i32_0 = arith.constant 0 : i32
    return %arg0, %c0_i32 : i32, i32
  }
  func.func @transform_1(%arg0: i32) -> (i32, i32) {
    %c0_i32 = arith.constant 0 : i32
    %c0_i32_0 = arith.constant 0 : i32
    return %arg0, %c0_i32 : i32, i32
  }
  func.func @transform_2(%arg0: i32) -> (i32, i32) {
    %c0_i32 = arith.constant 0 : i32
    %c0_i32_0 = arith.constant 0 : i32
    return %arg0, %c0_i32 : i32, i32
  }
  func.func @transform_3(%arg0: i32) -> (i32, i32) {
    %c0_i32 = arith.constant 0 : i32
    %c0_i32_0 = arith.constant 0 : i32
    return %arg0, %c0_i32 : i32, i32
  }
  func.func @transform_4(%arg0: i32) -> (i32, i32, i32) {
    %c0_i32 = arith.constant 0 : i32
    %c0_i32_0 = arith.constant 0 : i32
    %c0_i32_1 = arith.constant 0 : i32
    %c0_i32_2 = arith.constant 0 : i32
    return %c0_i32, %c0_i32_0, %c0_i32_1 : i32, i32, i32
  }
  func.func @transform_5(%arg0: i32) -> (i32, i32) {
    %c0_i32 = arith.constant 0 : i32
    %c0_i32_0 = arith.constant 0 : i32
    return %arg0, %c0_i32 : i32, i32
  }
}

</mosaic_0001>

<bundles_post_ra>
// kernel: tpu_custom_call.1
= control target key start
LH: loop header
LB: loop body
LE: loop exit
PB: predicated region body
PF: predicated region fallthrough
CT: control target
= control target key end

     0   :  { %10 = vsyncpa [#allocation3], 0  ;;  %s1988_s0 = inlined_call_operand.hbm [shape: f32[8,256], index: 0, kind: input, shape index: {}]   ;;  %s1989_s1 = inlined_call_operand.hbm [shape: f32[8,256], index: 1, kind: input, shape index: {}]   ;;  %s1990_s2 = inlined_call_operand.hbm [shape: f32[8,256], index: 2, kind: input, shape index: {}]   ;;  %s1991_s3 = inlined_call_operand.hbm [shape: f32[8,256], index: 3, kind: input, shape index: {}]   ;;  %s1992_s4 = inlined_call_operand.hbm [shape: f32[4,256,768], index: 4, kind: input, shape index: {}]   ;;  %s1993_s5 = inlined_call_operand.hbm [shape: f32[8,768], index: 5, kind: output, shape index: {}]  }
   0x1   :  { %11 = vsyncpa [#allocation6], 0 }
   0x2   :  { %12 = vsyncpa [#allocation9], 0 }
   0x3   :  { %13 = vsyncpa [#allocation4], 0  ;;  %s1883_s18 = smov [#allocation5]   ;;  %s1884_s20 = smov [#allocation8]  }
   0x4   :  { %s30_s19 = sshll.u32 %s1883_s18, 4  ;;  %s50_s21 = sshll.u32 %s1884_s20, 4  ;;  %s31_s19 = int_to_ptr.vmem [resolvable:$true] %s30_s19  ;;  %s51_s21 = int_to_ptr.vmem [resolvable:$true] %s50_s21 }
   0x5   :  { %s1763_s22 = scalar_lea.vmem %s31_s19, 256  ;;  %p1768_p1 = scmp.lt.s32.totalorder %s31_s19, %s31_s19 }
   0x6   :  { %p1764_p0 = scmp.ne.s32.totalorder %s31_s19, %s1763_s22  ;;  %p1769_p2 = scmp.lt.s32.totalorder %s1763_s22, %s1763_s22 }
   0x8   :  { %p1770_p3 = por %p1769_p2, %p1768_p1 }
   0xa   :  { %p1771_p4 = pnand %p1770_p3, %p1764_p0 }
   0xc   :  { %1774 = shalt.err (!%p1771_p4)
}
   0xd   :  { %33 = dma.hbm_to_vmem [thread:$0]  %s1989_s1, 256, %s31_s19, [#allocation6]  }
   0xe   :  { %s1783_s25 = scalar_lea.vmem %s51_s21, 256  ;;  %p1788_p6 = scmp.lt.s32.totalorder %s51_s21, %s51_s21 }
   0xf   :  { %p1784_p5 = scmp.ne.s32.totalorder %s51_s21, %s1783_s25  ;;  %p1789_p7 = scmp.lt.s32.totalorder %s1783_s25, %s1783_s25 }
  0x11   :  { %p1790_p8 = por %p1789_p7, %p1788_p6 }
  0x13   :  { %p1791_p9 = pnand %p1790_p8, %p1784_p5 }
  0x15   :  { %1794 = shalt.err (!%p1791_p9)
}
  0x16   :  { %53 = dma.hbm_to_vmem [thread:$0]  %s1991_s3, 256, %s51_s21, [#allocation9]  }
  0x17   :  { %s1885_s28 = smov [#allocation2]   ;;  %s1886_s30 = smov [#allocation7]  }
  0x18   :  { %s20_s29 = sshll.u32 %s1885_s28, 4  ;;  %s40_s6 = sshll.u32 %s1886_s30, 4  ;;  %s21_s29 = int_to_ptr.vmem [resolvable:$true] %s20_s29  ;;  %s41_s6 = int_to_ptr.vmem [resolvable:$true] %s40_s6 }
  0x19   :  { %s1803_s7 = scalar_lea.vmem %s21_s29, 256  ;;  %p1808_p11 = scmp.lt.s32.totalorder %s21_s29, %s21_s29 }
  0x1a   :  { %p1804_p10 = scmp.ne.s32.totalorder %s21_s29, %s1803_s7  ;;  %p1809_p12 = scmp.lt.s32.totalorder %s1803_s7, %s1803_s7 }
  0x1c   :  { %p1810_p13 = por %p1809_p12, %p1808_p11 }
  0x1e   :  { %p1811_p0 = pnand %p1810_p13, %p1804_p10 }
  0x20   :  { %1814 = shalt.err (!%p1811_p0)
}
  0x21   :  { %23 = dma.hbm_to_vmem [thread:$0]  %s1988_s0, 256, %s21_s29, [#allocation3]  }
  0x22   :  { %s1823_s9 = scalar_lea.vmem %s41_s6, 256  ;;  %p1828_p2 = scmp.lt.s32.totalorder %s41_s6, %s41_s6 }
  0x23   :  { %p1824_p1 = scmp.ne.s32.totalorder %s41_s6, %s1823_s9  ;;  %p1829_p3 = scmp.lt.s32.totalorder %s1823_s9, %s1823_s9 }
  0x25   :  { %p1830_p4 = por %p1829_p3, %p1828_p2 }
  0x27   :  { %p1831_p5 = pnand %p1830_p4, %p1824_p1 }
  0x29   :  { %1834 = shalt.err (!%p1831_p5)
}
  0x2a   :  { %43 = dma.hbm_to_vmem [thread:$0]  %s1990_s2, 256, %s41_s6, [#allocation6]  }
  0x2b   :  { %s1887_s11 = smov [#allocation10]  }
  0x2c   :  { %s59_s12 = sshll.u32 %s1887_s11, 4  ;;  %s60_s12 = int_to_ptr.vmem [resolvable:$true] %s59_s12 }
  0x2d   :  { %s1843_s13 = scalar_lea.vmem %s60_s12, 98304  ;;  %p1848_p7 = scmp.lt.s32.totalorder %s60_s12, %s60_s12 }
  0x2e   :  { %p1844_p6 = scmp.ne.s32.totalorder %s60_s12, %s1843_s13  ;;  %p1849_p8 = scmp.lt.s32.totalorder %s1843_s13, %s1843_s13 }
  0x30   :  { %p1850_p9 = por %p1849_p8, %p1848_p7 }
  0x32   :  { %p1851_p10 = pnand %p1850_p9, %p1844_p6 }
  0x34   :  { %1854 = shalt.err (!%p1851_p10)
}
  0x35   :  { %s1888_s0 = smov 768   ;;  %s1889_s14 = smov 48  }
  0x36   :  { %65 = dma.hbm_to_vmem [thread:$0]  %s1992_s4, 98304, %s60_s12, [#allocation9], %s1888_s0, %s1888_s0, %s1889_s14  }
  0x37   :  { %1875 = dma.done.wait [#allocation3], 256  }
  0x38   :  { %1876 = vsyncadd [#allocation3], 4294967040 }
  0x39   :  { %1877 = dma.done.wait [#allocation6], 512  }
  0x3a   :  { %1878 = vsyncadd [#allocation6], 4294966784 }
  0x3b   :  { %1879 = dma.done.wait [#allocation9], 98560  }
  0x3c   :  { %1880 = vsyncadd [#allocation9], 4294868736  ;;  %v369_v0 = vld [vmem:[#allocation10 + $0x8d8] sm:$0xff]  ;;  %v371_v1 = vld [vmem:[#allocation10 + $0x8e8] sm:$0xff]  ;;  %s1890_s2 = smov [#allocation11]  }
  0x3d   :  { %v368_v2 = vld [vmem:[#allocation10 + $0x8d0] sm:$0xff]  ;;  %470 = vmatprep.subr.mxu0 %v369_v0  ;;  %541 = vmatprep.subr.mxu1 %v371_v1  ;;  %v370_v3 = vld [vmem:[#allocation10 + $0x8e0] sm:$0xff]  ;;  %v363_v4 = vld [vmem:[#allocation10 + $0x8a8] sm:$0xff]  ;;  %s1736_s4 = sshll.u32 %s1890_s2, 4  ;;  %s1737_s4 = int_to_ptr.vmem [resolvable:$true] %s1736_s4 }
  0x3e   :  { %v365_v5 = vld [vmem:[#allocation10 + $0x8b8] sm:$0xff]  ;;  %471 = vmatpush1.msra.mxu0 %v368_v2  ;;  %542 = vmatpush1.msra.mxu1 %v370_v3  ;;  %v362_v6 = vld [vmem:[#allocation10 + $0x8a0] sm:$0xff]  ;;  %v364_v7 = vld [vmem:[#allocation10 + $0x8b0] sm:$0xff]  ;;  %s1855_s17 = scalar_lea.vmem %s1737_s4, 768  ;;  %p1860_p12 = scmp.lt.s32.totalorder %s1737_s4, %s1737_s4 }
  0x3f   :  { %v357_v8 = vld [vmem:[#allocation10 + $0x878] sm:$0xff]  ;;  %472 = vmatprep.subr.mxu0 %v363_v4  ;;  %543 = vmatprep.subr.mxu1 %v365_v5  ;;  %v359_v9 = vld [vmem:[#allocation10 + $0x888] sm:$0xff]  ;;  %v356_v10 = vld [vmem:[#allocation10 + $0x870] sm:$0xff]  ;;  %p1856_p11 = scmp.ne.s32.totalorder %s1737_s4, %s1855_s17  ;;  %p1861_p13 = scmp.lt.s32.totalorder %s1855_s17, %s1855_s17 }
  0x40   :  { %v358_v11 = vld [vmem:[#allocation10 + $0x880] sm:$0xff]  ;;  %473 = vmatpush1.msra.mxu0 %v362_v6  ;;  %544 = vmatpush1.msra.mxu1 %v364_v7  ;;  %v351_v12 = vld [vmem:[#allocation10 + $0x848] sm:$0xff]  ;;  %v353_v13 = vld [vmem:[#allocation10 + $0x858] sm:$0xff] }
  0x41   :  { %474 = vmatprep.subr.mxu0 %v357_v8  ;;  %545 = vmatprep.subr.mxu1 %v359_v9  ;;  %v350_v14 = vld [vmem:[#allocation10 + $0x840] sm:$0xff]  ;;  %v352_v15 = vld [vmem:[#allocation10 + $0x850] sm:$0xff]  ;;  %v345_v16 = vld [vmem:[#allocation10 + $0x818] sm:$0xff]  ;;  %p1862_p0 = por %p1861_p13, %p1860_p12 }
  0x42   :  { %475 = vmatpush1.msra.mxu0 %v356_v10  ;;  %546 = vmatpush1.msra.mxu1 %v358_v11  ;;  %v347_v17 = vld [vmem:[#allocation10 + $0x828] sm:$0xff]  ;;  %v344_v18 = vld [vmem:[#allocation10 + $0x810] sm:$0xff]  ;;  %v346_v19 = vld [vmem:[#allocation10 + $0x820] sm:$0xff] }
  0x43   :  { %476 = vmatprep.subr.mxu0 %v351_v12  ;;  %547 = vmatprep.subr.mxu1 %v353_v13  ;;  %v339_v20 = vld [vmem:[#allocation10 + $0x7e8] sm:$0xff]  ;;  %v341_v21 = vld [vmem:[#allocation10 + $0x7f8] sm:$0xff]  ;;  %v338_v22 = vld [vmem:[#allocation10 + $0x7e0] sm:$0xff]  ;;  %p1863_p1 = pnand %p1862_p0, %p1856_p11 }
  0x44   :  { %477 = vmatpush1.msra.mxu0 %v350_v14  ;;  %548 = vmatpush1.msra.mxu1 %v352_v15  ;;  %v340_v23 = vld [vmem:[#allocation10 + $0x7f0] sm:$0xff]  ;;  %v333_v24 = vld [vmem:[#allocation10 + $0x7b8] sm:$0xff]  ;;  %v335_v25 = vld [vmem:[#allocation10 + $0x7c8] sm:$0xff] }
  0x45   :  { %478 = vmatprep.subr.mxu0 %v345_v16  ;;  %549 = vmatprep.subr.mxu1 %v347_v17  ;;  %v332_v26 = vld [vmem:[#allocation10 + $0x7b0] sm:$0xff]  ;;  %v334_v27 = vld [vmem:[#allocation10 + $0x7c0] sm:$0xff]  ;;  %v327_v28 = vld [vmem:[#allocation10 + $0x788] sm:$0xff] }
  0x46   :  { %479 = vmatpush1.msra.mxu0 %v344_v18  ;;  %550 = vmatpush1.msra.mxu1 %v346_v19  ;;  %v329_v29 = vld [vmem:[#allocation10 + $0x798] sm:$0xff]  ;;  %v326_v30 = vld [vmem:[#allocation10 + $0x780] sm:$0xff]  ;;  %v328_v31 = vld [vmem:[#allocation10 + $0x790] sm:$0xff] }
  0x47   :  { %480 = vmatprep.subr.mxu0 %v339_v20  ;;  %551 = vmatprep.subr.mxu1 %v341_v21  ;;  %v321_v32 = vld [vmem:[#allocation10 + $0x758] sm:$0xff]  ;;  %v323_v33 = vld [vmem:[#allocation10 + $0x768] sm:$0xff]  ;;  %v320_v34 = vld [vmem:[#allocation10 + $0x750] sm:$0xff] }
  0x48   :  { %481 = vmatpush1.msra.mxu0 %v338_v22  ;;  %552 = vmatpush1.msra.mxu1 %v340_v23  ;;  %v322_v35 = vld [vmem:[#allocation10 + $0x760] sm:$0xff]  ;;  %v315_v36 = vld [vmem:[#allocation10 + $0x728] sm:$0xff]  ;;  %v317_v37 = vld [vmem:[#allocation10 + $0x738] sm:$0xff] }
  0x49   :  { %482 = vmatprep.subr.mxu0 %v333_v24  ;;  %553 = vmatprep.subr.mxu1 %v335_v25  ;;  %v314_v38 = vld [vmem:[#allocation10 + $0x720] sm:$0xff]  ;;  %v316_v39 = vld [vmem:[#allocation10 + $0x730] sm:$0xff]  ;;  %v309_v40 = vld [vmem:[#allocation10 + $0x6f8] sm:$0xff] }
  0x4a   :  { %483 = vmatpush1.msra.mxu0 %v332_v26  ;;  %554 = vmatpush1.msra.mxu1 %v334_v27  ;;  %v311_v41 = vld [vmem:[#allocation10 + $0x708] sm:$0xff]  ;;  %v308_v42 = vld [vmem:[#allocation10 + $0x6f0] sm:$0xff]  ;;  %v310_v43 = vld [vmem:[#allocation10 + $0x700] sm:$0xff] }
  0x4b   :  { %484 = vmatprep.subr.mxu0 %v327_v28  ;;  %555 = vmatprep.subr.mxu1 %v329_v29  ;;  %v303_v44 = vld [vmem:[#allocation10 + $0x6c8] sm:$0xff]  ;;  %v305_v45 = vld [vmem:[#allocation10 + $0x6d8] sm:$0xff]  ;;  %v302_v46 = vld [vmem:[#allocation10 + $0x6c0] sm:$0xff] }
  0x4c   :  { %485 = vmatpush1.msra.mxu0 %v326_v30  ;;  %556 = vmatpush1.msra.mxu1 %v328_v31  ;;  %v304_v47 = vld [vmem:[#allocation10 + $0x6d0] sm:$0xff]  ;;  %v297_v48 = vld [vmem:[#allocation10 + $0x698] sm:$0xff]  ;;  %v299_v49 = vld [vmem:[#allocation10 + $0x6a8] sm:$0xff] }
  0x4d   :  { %486 = vmatprep.subr.mxu0 %v321_v32  ;;  %557 = vmatprep.subr.mxu1 %v323_v33  ;;  %v296_v50 = vld [vmem:[#allocation10 + $0x690] sm:$0xff]  ;;  %v298_v51 = vld [vmem:[#allocation10 + $0x6a0] sm:$0xff]  ;;  %v291_v52 = vld [vmem:[#allocation10 + $0x668] sm:$0xff] }
  0x4e   :  { %487 = vmatpush1.msra.mxu0 %v320_v34  ;;  %558 = vmatpush1.msra.mxu1 %v322_v35  ;;  %v293_v53 = vld [vmem:[#allocation10 + $0x678] sm:$0xff]  ;;  %v290_v54 = vld [vmem:[#allocation10 + $0x660] sm:$0xff]  ;;  %v292_v55 = vld [vmem:[#allocation10 + $0x670] sm:$0xff] }
  0x4f   :  { %488 = vmatprep.subr.mxu0 %v315_v36  ;;  %559 = vmatprep.subr.mxu1 %v317_v37  ;;  %v285_v56 = vld [vmem:[#allocation10 + $0x638] sm:$0xff]  ;;  %v287_v57 = vld [vmem:[#allocation10 + $0x648] sm:$0xff]  ;;  %v284_v58 = vld [vmem:[#allocation10 + $0x630] sm:$0xff] }
  0x50   :  { %489 = vmatpush1.msra.mxu0 %v314_v38  ;;  %560 = vmatpush1.msra.mxu1 %v316_v39  ;;  %v286_v59 = vld [vmem:[#allocation10 + $0x640] sm:$0xff]  ;;  %v279_v60 = vld [vmem:[#allocation10 + $0x608] sm:$0xff]  ;;  %v281_v61 = vld [vmem:[#allocation10 + $0x618] sm:$0xff] }
  0x51   :  { %490 = vmatprep.subr.mxu0 %v309_v40  ;;  %561 = vmatprep.subr.mxu1 %v311_v41  ;;  %v278_v62 = vld [vmem:[#allocation10 + $0x600] sm:$0xff]  ;;  %v280_v63 = vld [vmem:[#allocation10 + $0x610] sm:$0xff]  ;;  %v465_v0 = vld [vmem:[#allocation10 + $0xbd8] sm:$0xff] }
  0x52   :  { %491 = vmatpush1.msra.mxu0 %v308_v42  ;;  %562 = vmatpush1.msra.mxu1 %v310_v43  ;;  %v467_v1 = vld [vmem:[#allocation10 + $0xbe8] sm:$0xff]  ;;  %v464_v2 = vld [vmem:[#allocation10 + $0xbd0] sm:$0xff]  ;;  %v466_v3 = vld [vmem:[#allocation10 + $0xbe0] sm:$0xff] }
  0x53   :  { %492 = vmatprep.subr.mxu0 %v303_v44  ;;  %563 = vmatprep.subr.mxu1 %v305_v45  ;;  %v459_v4 = vld [vmem:[#allocation10 + $0xba8] sm:$0xff]  ;;  %v461_v5 = vld [vmem:[#allocation10 + $0xbb8] sm:$0xff]  ;;  %v458_v6 = vld [vmem:[#allocation10 + $0xba0] sm:$0xff] }
  0x54   :  { %493 = vmatpush1.msra.mxu0 %v302_v46  ;;  %564 = vmatpush1.msra.mxu1 %v304_v47  ;;  %v460_v7 = vld [vmem:[#allocation10 + $0xbb0] sm:$0xff]  ;;  %v453_v8 = vld [vmem:[#allocation10 + $0xb78] sm:$0xff]  ;;  %v455_v9 = vld [vmem:[#allocation10 + $0xb88] sm:$0xff] }
  0x55   :  { %494 = vmatprep.subr.mxu0 %v297_v48  ;;  %565 = vmatprep.subr.mxu1 %v299_v49  ;;  %v452_v10 = vld [vmem:[#allocation10 + $0xb70] sm:$0xff]  ;;  %v454_v11 = vld [vmem:[#allocation10 + $0xb80] sm:$0xff]  ;;  %v447_v12 = vld [vmem:[#allocation10 + $0xb48] sm:$0xff] }
  0x56   :  { %495 = vmatpush1.msra.mxu0 %v296_v50  ;;  %566 = vmatpush1.msra.mxu1 %v298_v51  ;;  %v449_v13 = vld [vmem:[#allocation10 + $0xb58] sm:$0xff]  ;;  %v446_v14 = vld [vmem:[#allocation10 + $0xb40] sm:$0xff]  ;;  %v448_v15 = vld [vmem:[#allocation10 + $0xb50] sm:$0xff] }
  0x57   :  { %496 = vmatprep.subr.mxu0 %v291_v52  ;;  %567 = vmatprep.subr.mxu1 %v293_v53  ;;  %v441_v16 = vld [vmem:[#allocation10 + $0xb18] sm:$0xff]  ;;  %v443_v17 = vld [vmem:[#allocation10 + $0xb28] sm:$0xff]  ;;  %v440_v18 = vld [vmem:[#allocation10 + $0xb10] sm:$0xff] }
  0x58   :  { %497 = vmatpush1.msra.mxu0 %v290_v54  ;;  %568 = vmatpush1.msra.mxu1 %v292_v55  ;;  %v442_v19 = vld [vmem:[#allocation10 + $0xb20] sm:$0xff]  ;;  %v435_v20 = vld [vmem:[#allocation10 + $0xae8] sm:$0xff]  ;;  %v437_v21 = vld [vmem:[#allocation10 + $0xaf8] sm:$0xff] }
  0x59   :  { %498 = vmatprep.subr.mxu0 %v285_v56  ;;  %569 = vmatprep.subr.mxu1 %v287_v57  ;;  %v434_v22 = vld [vmem:[#allocation10 + $0xae0] sm:$0xff]  ;;  %v436_v23 = vld [vmem:[#allocation10 + $0xaf0] sm:$0xff]  ;;  %v429_v24 = vld [vmem:[#allocation10 + $0xab8] sm:$0xff] }
  0x5a   :  { %499 = vmatpush1.msra.mxu0 %v284_v58  ;;  %570 = vmatpush1.msra.mxu1 %v286_v59  ;;  %v431_v25 = vld [vmem:[#allocation10 + $0xac8] sm:$0xff]  ;;  %v428_v26 = vld [vmem:[#allocation10 + $0xab0] sm:$0xff]  ;;  %v430_v27 = vld [vmem:[#allocation10 + $0xac0] sm:$0xff] }
  0x5b   :  { %500 = vmatprep.subr.mxu0 %v279_v60  ;;  %571 = vmatprep.subr.mxu1 %v281_v61  ;;  %v423_v28 = vld [vmem:[#allocation10 + $0xa88] sm:$0xff]  ;;  %v425_v29 = vld [vmem:[#allocation10 + $0xa98] sm:$0xff]  ;;  %v422_v30 = vld [vmem:[#allocation10 + $0xa80] sm:$0xff] }
  0x5c   :  { %501 = vmatpush1.msra.mxu0 %v278_v62  ;;  %572 = vmatpush1.msra.mxu1 %v280_v63  ;;  %v424_v31 = vld [vmem:[#allocation10 + $0xa90] sm:$0xff]  ;;  %v417_v32 = vld [vmem:[#allocation10 + $0xa58] sm:$0xff]  ;;  %v419_v33 = vld [vmem:[#allocation10 + $0xa68] sm:$0xff] }
  0x5d   :  { %502 = vmatprep.subr.mxu0 %v465_v0  ;;  %573 = vmatprep.subr.mxu1 %v467_v1  ;;  %v416_v34 = vld [vmem:[#allocation10 + $0xa50] sm:$0xff]  ;;  %v418_v35 = vld [vmem:[#allocation10 + $0xa60] sm:$0xff]  ;;  %v411_v36 = vld [vmem:[#allocation10 + $0xa28] sm:$0xff] }
  0x5e   :  { %503 = vmatpush2.msra.mxu0 %v464_v2  ;;  %574 = vmatpush2.msra.mxu1 %v466_v3  ;;  %v413_v37 = vld [vmem:[#allocation10 + $0xa38] sm:$0xff]  ;;  %v410_v38 = vld [vmem:[#allocation10 + $0xa20] sm:$0xff]  ;;  %v412_v39 = vld [vmem:[#allocation10 + $0xa30] sm:$0xff] }
  0x5f   :  { %504 = vmatprep.subr.mxu0 %v459_v4  ;;  %575 = vmatprep.subr.mxu1 %v461_v5  ;;  %v405_v40 = vld [vmem:[#allocation10 + $0x9f8] sm:$0xff]  ;;  %v407_v41 = vld [vmem:[#allocation10 + $0xa08] sm:$0xff]  ;;  %v404_v42 = vld [vmem:[#allocation10 + $0x9f0] sm:$0xff] }
  0x60   :  { %505 = vmatpush2.msra.mxu0 %v458_v6  ;;  %576 = vmatpush2.msra.mxu1 %v460_v7  ;;  %v406_v43 = vld [vmem:[#allocation10 + $0xa00] sm:$0xff]  ;;  %v399_v44 = vld [vmem:[#allocation10 + $0x9c8] sm:$0xff]  ;;  %v401_v45 = vld [vmem:[#allocation10 + $0x9d8] sm:$0xff] }
  0x61   :  { %506 = vmatprep.subr.mxu0 %v453_v8  ;;  %577 = vmatprep.subr.mxu1 %v455_v9  ;;  %v398_v46 = vld [vmem:[#allocation10 + $0x9c0] sm:$0xff]  ;;  %v400_v47 = vld [vmem:[#allocation10 + $0x9d0] sm:$0xff]  ;;  %v393_v48 = vld [vmem:[#allocation10 + $0x998] sm:$0xff] }
  0x62   :  { %507 = vmatpush2.msra.mxu0 %v452_v10  ;;  %578 = vmatpush2.msra.mxu1 %v454_v11  ;;  %v395_v49 = vld [vmem:[#allocation10 + $0x9a8] sm:$0xff]  ;;  %v392_v50 = vld [vmem:[#allocation10 + $0x990] sm:$0xff]  ;;  %v394_v51 = vld [vmem:[#allocation10 + $0x9a0] sm:$0xff] }
  0x63   :  { %508 = vmatprep.subr.mxu0 %v447_v12  ;;  %579 = vmatprep.subr.mxu1 %v449_v13  ;;  %v387_v52 = vld [vmem:[#allocation10 + $0x968] sm:$0xff]  ;;  %v389_v53 = vld [vmem:[#allocation10 + $0x978] sm:$0xff]  ;;  %v386_v54 = vld [vmem:[#allocation10 + $0x960] sm:$0xff] }
  0x64   :  { %509 = vmatpush2.msra.mxu0 %v446_v14  ;;  %580 = vmatpush2.msra.mxu1 %v448_v15  ;;  %v388_v55 = vld [vmem:[#allocation10 + $0x970] sm:$0xff]  ;;  %v381_v56 = vld [vmem:[#allocation10 + $0x938] sm:$0xff]  ;;  %v383_v57 = vld [vmem:[#allocation10 + $0x948] sm:$0xff] }
  0x65   :  { %510 = vmatprep.subr.mxu0 %v441_v16  ;;  %581 = vmatprep.subr.mxu1 %v443_v17  ;;  %v380_v58 = vld [vmem:[#allocation10 + $0x930] sm:$0xff]  ;;  %v382_v59 = vld [vmem:[#allocation10 + $0x940] sm:$0xff]  ;;  %v375_v60 = vld [vmem:[#allocation10 + $0x908] sm:$0xff] }
  0x66   :  { %511 = vmatpush2.msra.mxu0 %v440_v18  ;;  %582 = vmatpush2.msra.mxu1 %v442_v19  ;;  %v377_v61 = vld [vmem:[#allocation10 + $0x918] sm:$0xff]  ;;  %v374_v62 = vld [vmem:[#allocation10 + $0x900] sm:$0xff]  ;;  %v376_v0 = vld [vmem:[#allocation10 + $0x910] sm:$0xff] }
  0x67   :  { %512 = vmatprep.subr.mxu0 %v435_v20  ;;  %583 = vmatprep.subr.mxu1 %v437_v21  ;;  %v1936_v63 = vld [vmem:[#allocation5 + $0x8] sm:$0xff]  ;;  %v1938_v1 = vld [vmem:[#allocation5] sm:$0xff]  ;;  %v367_v6 = vld [vmem:[#allocation10 + $0x8c8] sm:$0xff] }
  0x68   :  { %513 = vmatpush2.msra.mxu0 %v434_v22  ;;  %584 = vmatpush2.msra.mxu1 %v436_v23  ;;  %v373_v2 = vld [vmem:[#allocation10 + $0x8f8] sm:$0xff]  ;;  %v372_v4 = vld [vmem:[#allocation10 + $0x8f0] sm:$0xff]  ;;  %v168_v7 = vld [vmem:[#allocation10 + $0x2a8] sm:$0xff] }
  0x69   :  { %514 = vmatprep.subr.mxu0 %v429_v24  ;;  %585 = vmatprep.subr.mxu1 %v431_v25  ;;  %v174_v3 = vld [vmem:[#allocation10 + $0x2d8] sm:$0xff]  ;;  %v173_v5 = vld [vmem:[#allocation10 + $0x2d0] sm:$0xff]  ;;  %v366_v8 = vld [vmem:[#allocation10 + $0x8c0] sm:$0xff] }
  0x6a   :  { %515 = vmatpush2.msra.mxu0 %v428_v26  ;;  %586 = vmatpush2.msra.mxu1 %v430_v27  ;;  %v167_v9 = vld [vmem:[#allocation10 + $0x2a0] sm:$0xff]  ;;  %v361_v10 = vld [vmem:[#allocation10 + $0x898] sm:$0xff]  ;;  %v360_v12 = vld [vmem:[#allocation10 + $0x890] sm:$0xff] }
  0x6b   :  { %516 = vmatprep.subr.mxu0 %v423_v28  ;;  %587 = vmatprep.subr.mxu1 %v425_v29  ;;  %v162_v11 = vld [vmem:[#allocation10 + $0x278] sm:$0xff]  ;;  %v161_v13 = vld [vmem:[#allocation10 + $0x270] sm:$0xff]  ;;  %v355_v14 = vld [vmem:[#allocation10 + $0x868] sm:$0xff] }
  0x6c   :  { %517 = vmatpush2.msra.mxu0 %v422_v30  ;;  %588 = vmatpush2.msra.mxu1 %v424_v31  ;;  %v156_v15 = vld [vmem:[#allocation10 + $0x248] sm:$0xff]  ;;  %v354_v16 = vld [vmem:[#allocation10 + $0x860] sm:$0xff]  ;;  %v349_v18 = vld [vmem:[#allocation10 + $0x838] sm:$0xff] }
  0x6d   :  { %518 = vmatprep.subr.mxu0 %v417_v32  ;;  %589 = vmatprep.subr.mxu1 %v419_v33  ;;  %v155_v17 = vld [vmem:[#allocation10 + $0x240] sm:$0xff]  ;;  %v150_v19 = vld [vmem:[#allocation10 + $0x218] sm:$0xff]  ;;  %v348_v20 = vld [vmem:[#allocation10 + $0x830] sm:$0xff] }
  0x6e   :  { %519 = vmatpush2.msra.mxu0 %v416_v34  ;;  %590 = vmatpush2.msra.mxu1 %v418_v35  ;;  %v149_v21 = vld [vmem:[#allocation10 + $0x210] sm:$0xff]  ;;  %v343_v22 = vld [vmem:[#allocation10 + $0x808] sm:$0xff]  ;;  %v342_v24 = vld [vmem:[#allocation10 + $0x800] sm:$0xff] }
  0x6f   :  { %520 = vmatprep.subr.mxu0 %v411_v36  ;;  %591 = vmatprep.subr.mxu1 %v413_v37  ;;  %v144_v23 = vld [vmem:[#allocation10 + $0x1e8] sm:$0xff]  ;;  %v143_v25 = vld [vmem:[#allocation10 + $0x1e0] sm:$0xff]  ;;  %v337_v26 = vld [vmem:[#allocation10 + $0x7d8] sm:$0xff] }
  0x70   :  { %521 = vmatpush2.msra.mxu0 %v410_v38  ;;  %592 = vmatpush2.msra.mxu1 %v412_v39  ;;  %v138_v27 = vld [vmem:[#allocation10 + $0x1b8] sm:$0xff]  ;;  %v336_v28 = vld [vmem:[#allocation10 + $0x7d0] sm:$0xff]  ;;  %v331_v30 = vld [vmem:[#allocation10 + $0x7a8] sm:$0xff] }
  0x71   :  { %522 = vmatprep.subr.mxu0 %v405_v40  ;;  %593 = vmatprep.subr.mxu1 %v407_v41  ;;  %v137_v29 = vld [vmem:[#allocation10 + $0x1b0] sm:$0xff]  ;;  %v132_v31 = vld [vmem:[#allocation10 + $0x188] sm:$0xff]  ;;  %v330_v32 = vld [vmem:[#allocation10 + $0x7a0] sm:$0xff] }
  0x72   :  { %523 = vmatpush2.msra.mxu0 %v404_v42  ;;  %594 = vmatpush2.msra.mxu1 %v406_v43  ;;  %v131_v33 = vld [vmem:[#allocation10 + $0x180] sm:$0xff]  ;;  %v325_v34 = vld [vmem:[#allocation10 + $0x778] sm:$0xff]  ;;  %v324_v36 = vld [vmem:[#allocation10 + $0x770] sm:$0xff] }
  0x73   :  { %524 = vmatprep.subr.mxu0 %v399_v44  ;;  %595 = vmatprep.subr.mxu1 %v401_v45  ;;  %v126_v35 = vld [vmem:[#allocation10 + $0x158] sm:$0xff]  ;;  %v125_v37 = vld [vmem:[#allocation10 + $0x150] sm:$0xff]  ;;  %v319_v38 = vld [vmem:[#allocation10 + $0x748] sm:$0xff] }
  0x74   :  { %525 = vmatpush2.msra.mxu0 %v398_v46  ;;  %596 = vmatpush2.msra.mxu1 %v400_v47  ;;  %v120_v39 = vld [vmem:[#allocation10 + $0x128] sm:$0xff]  ;;  %v318_v40 = vld [vmem:[#allocation10 + $0x740] sm:$0xff]  ;;  %v313_v42 = vld [vmem:[#allocation10 + $0x718] sm:$0xff] }
  0x75   :  { %526 = vmatprep.subr.mxu0 %v393_v48  ;;  %597 = vmatprep.subr.mxu1 %v395_v49  ;;  %v119_v41 = vld [vmem:[#allocation10 + $0x120] sm:$0xff]  ;;  %v114_v43 = vld [vmem:[#allocation10 + $0xf8] sm:$0xff]  ;;  %v312_v44 = vld [vmem:[#allocation10 + $0x710] sm:$0xff] }
  0x76   :  { %527 = vmatpush2.msra.mxu0 %v392_v50  ;;  %598 = vmatpush2.msra.mxu1 %v394_v51  ;;  %v113_v45 = vld [vmem:[#allocation10 + $0xf0] sm:$0xff]  ;;  %v307_v46 = vld [vmem:[#allocation10 + $0x6e8] sm:$0xff]  ;;  %v306_v48 = vld [vmem:[#allocation10 + $0x6e0] sm:$0xff] }
  0x77   :  { %528 = vmatprep.subr.mxu0 %v387_v52  ;;  %599 = vmatprep.subr.mxu1 %v389_v53  ;;  %v108_v47 = vld [vmem:[#allocation10 + $0xc8] sm:$0xff]  ;;  %v107_v49 = vld [vmem:[#allocation10 + $0xc0] sm:$0xff]  ;;  %v301_v50 = vld [vmem:[#allocation10 + $0x6b8] sm:$0xff] }
  0x78   :  { %529 = vmatpush2.msra.mxu0 %v386_v54  ;;  %600 = vmatpush2.msra.mxu1 %v388_v55  ;;  %v102_v51 = vld [vmem:[#allocation10 + $0x98] sm:$0xff]  ;;  %v300_v52 = vld [vmem:[#allocation10 + $0x6b0] sm:$0xff]  ;;  %v295_v54 = vld [vmem:[#allocation10 + $0x688] sm:$0xff] }
  0x79   :  { %530 = vmatprep.subr.mxu0 %v381_v56  ;;  %601 = vmatprep.subr.mxu1 %v383_v57  ;;  %v101_v53 = vld [vmem:[#allocation10 + $0x90] sm:$0xff]  ;;  %v96_v55 = vld [vmem:[#allocation10 + $0x68] sm:$0xff]  ;;  %v294_v56 = vld [vmem:[#allocation10 + $0x680] sm:$0xff] }
  0x7a   :  { %531 = vmatpush2.msra.mxu0 %v380_v58  ;;  %602 = vmatpush2.msra.mxu1 %v382_v59  ;;  %v95_v57 = vld [vmem:[#allocation10 + $0x60] sm:$0xff]  ;;  %v289_v58 = vld [vmem:[#allocation10 + $0x658] sm:$0xff] }
  0x7b   :  { %532 = vmatprep.subr.mxu0 %v375_v60  ;;  %603 = vmatprep.subr.mxu1 %v377_v61  ;;  %v90_v59 = vld [vmem:[#allocation10 + $0x38] sm:$0xff]  ;;  %v288_v60 = vld [vmem:[#allocation10 + $0x650] sm:$0xff] }
  0x7c   :  { %533 = vmatpush2.msra.mxu0 %v374_v62  ;;  %534 = vmatprep.mubr.f32.mxu0 %v1936_v63  ;;  %v89_v61 = vld [vmem:[#allocation10 + $0x30] sm:$0xff]  ;;  %v283_v62 = vld [vmem:[#allocation10 + $0x628] sm:$0xff] }
  0x7d   :  { %604 = vmatpush2.msra.mxu1 %v376_v0  ;;  %605 = vmatprep.mubr.f32.mxu1 %v1936_v63  ;;  %v84_v0 = vld [vmem:[#allocation10 + $0x8] sm:$0xff] }
  0x7e   :  { %535 = vmatmul.mubr.f32.vlgmr.msra.gmra.mxu0 %v1938_v1  ;;  %606 = vmatmul.mubr.f32.vlgmr.msra.gmra.mxu1 %v1938_v1 }
  0x7f   :  { %612 = vmatprep.subr.mxu0 %v373_v2  ;;  %683 = vmatprep.subr.mxu1 %v174_v3  ;;  %v282_v2 = vld [vmem:[#allocation10 + $0x620] sm:$0xff] }
  0x80   :  { %613 = vmatpush1.msra.mxu0 %v372_v4  ;;  %684 = vmatpush1.msra.mxu1 %v173_v5  ;;  %v83_v3 = vld [vmem:[#allocation10] sm:$0xff]  ;;  %v469_v4 = vld [vmem:[#allocation10 + $0xbf8] sm:$0xff] }
  0x81   :  { %614 = vmatprep.subr.mxu0 %v367_v6  ;;  %685 = vmatprep.subr.mxu1 %v168_v7  ;;  %v270_v5 = vld [vmem:[#allocation10 + $0x5d8] sm:$0xff]  ;;  %v468_v6 = vld [vmem:[#allocation10 + $0xbf0] sm:$0xff] }
  0x82   :  { %615 = vmatpush1.msra.mxu0 %v366_v8  ;;  %686 = vmatpush1.msra.mxu1 %v167_v9  ;;  %v269_v7 = vld [vmem:[#allocation10 + $0x5d0] sm:$0xff]  ;;  %v463_v8 = vld [vmem:[#allocation10 + $0xbc8] sm:$0xff] }
  0x83   :  { %616 = vmatprep.subr.mxu0 %v361_v10  ;;  %687 = vmatprep.subr.mxu1 %v162_v11  ;;  %v264_v9 = vld [vmem:[#allocation10 + $0x5a8] sm:$0xff]  ;;  %v462_v10 = vld [vmem:[#allocation10 + $0xbc0] sm:$0xff] }
  0x84   :  { %617 = vmatpush1.msra.mxu0 %v360_v12  ;;  %688 = vmatpush1.msra.mxu1 %v161_v13  ;;  %v263_v11 = vld [vmem:[#allocation10 + $0x5a0] sm:$0xff]  ;;  %v457_v12 = vld [vmem:[#allocation10 + $0xb98] sm:$0xff] }
  0x85   :  { %618 = vmatprep.subr.mxu0 %v355_v14  ;;  %689 = vmatprep.subr.mxu1 %v156_v15  ;;  %v258_v13 = vld [vmem:[#allocation10 + $0x578] sm:$0xff]  ;;  %v456_v14 = vld [vmem:[#allocation10 + $0xb90] sm:$0xff] }
  0x86   :  { %619 = vmatpush1.msra.mxu0 %v354_v16  ;;  %690 = vmatpush1.msra.mxu1 %v155_v17  ;;  %v257_v15 = vld [vmem:[#allocation10 + $0x570] sm:$0xff]  ;;  %v451_v16 = vld [vmem:[#allocation10 + $0xb68] sm:$0xff] }
  0x87   :  { %620 = vmatprep.subr.mxu0 %v349_v18  ;;  %691 = vmatprep.subr.mxu1 %v150_v19  ;;  %v252_v17 = vld [vmem:[#allocation10 + $0x548] sm:$0xff]  ;;  %v450_v18 = vld [vmem:[#allocation10 + $0xb60] sm:$0xff] }
  0x88   :  { %621 = vmatpush1.msra.mxu0 %v348_v20  ;;  %692 = vmatpush1.msra.mxu1 %v149_v21  ;;  %v251_v19 = vld [vmem:[#allocation10 + $0x540] sm:$0xff]  ;;  %v445_v20 = vld [vmem:[#allocation10 + $0xb38] sm:$0xff] }
  0x89   :  { %622 = vmatprep.subr.mxu0 %v343_v22  ;;  %693 = vmatprep.subr.mxu1 %v144_v23  ;;  %v246_v21 = vld [vmem:[#allocation10 + $0x518] sm:$0xff]  ;;  %v444_v22 = vld [vmem:[#allocation10 + $0xb30] sm:$0xff] }
  0x8a   :  { %623 = vmatpush1.msra.mxu0 %v342_v24  ;;  %694 = vmatpush1.msra.mxu1 %v143_v25  ;;  %v245_v23 = vld [vmem:[#allocation10 + $0x510] sm:$0xff]  ;;  %v439_v24 = vld [vmem:[#allocation10 + $0xb08] sm:$0xff] }
  0x8b   :  { %624 = vmatprep.subr.mxu0 %v337_v26  ;;  %695 = vmatprep.subr.mxu1 %v138_v27  ;;  %v240_v25 = vld [vmem:[#allocation10 + $0x4e8] sm:$0xff]  ;;  %v438_v26 = vld [vmem:[#allocation10 + $0xb00] sm:$0xff] }
  0x8c   :  { %625 = vmatpush1.msra.mxu0 %v336_v28  ;;  %696 = vmatpush1.msra.mxu1 %v137_v29  ;;  %v239_v27 = vld [vmem:[#allocation10 + $0x4e0] sm:$0xff]  ;;  %v433_v28 = vld [vmem:[#allocation10 + $0xad8] sm:$0xff] }
  0x8d   :  { %626 = vmatprep.subr.mxu0 %v331_v30  ;;  %697 = vmatprep.subr.mxu1 %v132_v31  ;;  %v234_v29 = vld [vmem:[#allocation10 + $0x4b8] sm:$0xff]  ;;  %v432_v30 = vld [vmem:[#allocation10 + $0xad0] sm:$0xff] }
  0x8e   :  { %627 = vmatpush1.msra.mxu0 %v330_v32  ;;  %698 = vmatpush1.msra.mxu1 %v131_v33  ;;  %v233_v31 = vld [vmem:[#allocation10 + $0x4b0] sm:$0xff]  ;;  %v427_v32 = vld [vmem:[#allocation10 + $0xaa8] sm:$0xff] }
  0x8f   :  { %628 = vmatprep.subr.mxu0 %v325_v34  ;;  %699 = vmatprep.subr.mxu1 %v126_v35  ;;  %v228_v33 = vld [vmem:[#allocation10 + $0x488] sm:$0xff]  ;;  %v426_v34 = vld [vmem:[#allocation10 + $0xaa0] sm:$0xff] }
  0x90   :  { %629 = vmatpush1.msra.mxu0 %v324_v36  ;;  %700 = vmatpush1.msra.mxu1 %v125_v37  ;;  %v227_v35 = vld [vmem:[#allocation10 + $0x480] sm:$0xff]  ;;  %v421_v36 = vld [vmem:[#allocation10 + $0xa78] sm:$0xff] }
  0x91   :  { %630 = vmatprep.subr.mxu0 %v319_v38  ;;  %701 = vmatprep.subr.mxu1 %v120_v39  ;;  %v222_v37 = vld [vmem:[#allocation10 + $0x458] sm:$0xff]  ;;  %v420_v38 = vld [vmem:[#allocation10 + $0xa70] sm:$0xff] }
  0x92   :  { %631 = vmatpush1.msra.mxu0 %v318_v40  ;;  %702 = vmatpush1.msra.mxu1 %v119_v41  ;;  %v221_v39 = vld [vmem:[#allocation10 + $0x450] sm:$0xff]  ;;  %v415_v40 = vld [vmem:[#allocation10 + $0xa48] sm:$0xff] }
  0x93   :  { %632 = vmatprep.subr.mxu0 %v313_v42  ;;  %703 = vmatprep.subr.mxu1 %v114_v43  ;;  %v216_v41 = vld [vmem:[#allocation10 + $0x428] sm:$0xff]  ;;  %v414_v42 = vld [vmem:[#allocation10 + $0xa40] sm:$0xff] }
  0x94   :  { %633 = vmatpush1.msra.mxu0 %v312_v44  ;;  %704 = vmatpush1.msra.mxu1 %v113_v45  ;;  %v215_v43 = vld [vmem:[#allocation10 + $0x420] sm:$0xff]  ;;  %v409_v44 = vld [vmem:[#allocation10 + $0xa18] sm:$0xff] }
  0x95   :  { %634 = vmatprep.subr.mxu0 %v307_v46  ;;  %705 = vmatprep.subr.mxu1 %v108_v47  ;;  %v210_v45 = vld [vmem:[#allocation10 + $0x3f8] sm:$0xff]  ;;  %v408_v46 = vld [vmem:[#allocation10 + $0xa10] sm:$0xff] }
  0x96   :  { %635 = vmatpush1.msra.mxu0 %v306_v48  ;;  %706 = vmatpush1.msra.mxu1 %v107_v49  ;;  %v209_v47 = vld [vmem:[#allocation10 + $0x3f0] sm:$0xff]  ;;  %v403_v48 = vld [vmem:[#allocation10 + $0x9e8] sm:$0xff] }
  0x97   :  { %636 = vmatprep.subr.mxu0 %v301_v50  ;;  %707 = vmatprep.subr.mxu1 %v102_v51  ;;  %v204_v49 = vld [vmem:[#allocation10 + $0x3c8] sm:$0xff]  ;;  %v402_v50 = vld [vmem:[#allocation10 + $0x9e0] sm:$0xff] }
  0x98   :  { %637 = vmatpush1.msra.mxu0 %v300_v52  ;;  %708 = vmatpush1.msra.mxu1 %v101_v53  ;;  %v203_v51 = vld [vmem:[#allocation10 + $0x3c0] sm:$0xff]  ;;  %v397_v52 = vld [vmem:[#allocation10 + $0x9b8] sm:$0xff] }
  0x99   :  { %638 = vmatprep.subr.mxu0 %v295_v54  ;;  %709 = vmatprep.subr.mxu1 %v96_v55  ;;  %v198_v53 = vld [vmem:[#allocation10 + $0x398] sm:$0xff]  ;;  %v396_v54 = vld [vmem:[#allocation10 + $0x9b0] sm:$0xff] }
  0x9a   :  { %639 = vmatpush1.msra.mxu0 %v294_v56  ;;  %710 = vmatpush1.msra.mxu1 %v95_v57  ;;  %v197_v55 = vld [vmem:[#allocation10 + $0x390] sm:$0xff]  ;;  %v391_v56 = vld [vmem:[#allocation10 + $0x988] sm:$0xff] }
  0x9b   :  { %640 = vmatprep.subr.mxu0 %v289_v58  ;;  %711 = vmatprep.subr.mxu1 %v90_v59  ;;  %v192_v57 = vld [vmem:[#allocation10 + $0x368] sm:$0xff]  ;;  %v390_v58 = vld [vmem:[#allocation10 + $0x980] sm:$0xff] }
  0x9c   :  { %641 = vmatpush1.msra.mxu0 %v288_v60  ;;  %712 = vmatpush1.msra.mxu1 %v89_v61  ;;  %v191_v59 = vld [vmem:[#allocation10 + $0x360] sm:$0xff]  ;;  %v385_v60 = vld [vmem:[#allocation10 + $0x958] sm:$0xff] }
  0x9d   :  { %642 = vmatprep.subr.mxu0 %v283_v62  ;;  %713 = vmatprep.subr.mxu1 %v84_v0  ;;  %v186_v61 = vld [vmem:[#allocation10 + $0x338] sm:$0xff]  ;;  %v384_v62 = vld [vmem:[#allocation10 + $0x950] sm:$0xff] }
  0x9e   :  { %643 = vmatpush1.msra.mxu0 %v282_v2  ;;  %714 = vmatpush1.msra.mxu1 %v83_v3  ;;  %v185_v0 = vld [vmem:[#allocation10 + $0x330] sm:$0xff]  ;;  %v379_v2 = vld [vmem:[#allocation10 + $0x928] sm:$0xff] }
  0x9f   :  { %644 = vmatprep.subr.mxu0 %v469_v4  ;;  %715 = vmatprep.subr.mxu1 %v270_v5  ;;  %v180_v3 = vld [vmem:[#allocation10 + $0x308] sm:$0xff]  ;;  %v378_v4 = vld [vmem:[#allocation10 + $0x920] sm:$0xff] }
  0xa0   :  { %645 = vmatpush2.msra.mxu0 %v468_v6  ;;  %716 = vmatpush2.msra.mxu1 %v269_v7  ;;  %v179_v5 = vld [vmem:[#allocation10 + $0x300] sm:$0xff]  ;;  %v1944_v6 = vld [vmem:[#allocation2 + $0x8] sm:$0xff] }
  0xa1   :  { %646 = vmatprep.subr.mxu0 %v463_v8  ;;  %717 = vmatprep.subr.mxu1 %v264_v9  ;;  %v1946_v7 = vld [vmem:[#allocation2] sm:$0xff]  ;;  %v176_v8 = vld [vmem:[#allocation10 + $0x2e8] sm:$0xff]  ;;  %v178_v9 = vld [vmem:[#allocation10 + $0x2f8] sm:$0xff] }
  0xa2   :  { %647 = vmatpush2.msra.mxu0 %v462_v10  ;;  %718 = vmatpush2.msra.mxu1 %v263_v11  ;;  %v175_v10 = vld [vmem:[#allocation10 + $0x2e0] sm:$0xff]  ;;  %v177_v11 = vld [vmem:[#allocation10 + $0x2f0] sm:$0xff] }
  0xa3   :  { %648 = vmatprep.subr.mxu0 %v457_v12  ;;  %719 = vmatprep.subr.mxu1 %v258_v13  ;;  %v170_v12 = vld [vmem:[#allocation10 + $0x2b8] sm:$0xff]  ;;  %v172_v13 = vld [vmem:[#allocation10 + $0x2c8] sm:$0xff] }
  0xa4   :  { %649 = vmatpush2.msra.mxu0 %v456_v14  ;;  %720 = vmatpush2.msra.mxu1 %v257_v15  ;;  %v169_v14 = vld [vmem:[#allocation10 + $0x2b0] sm:$0xff]  ;;  %v171_v15 = vld [vmem:[#allocation10 + $0x2c0] sm:$0xff] }
  0xa5   :  { %650 = vmatprep.subr.mxu0 %v451_v16  ;;  %721 = vmatprep.subr.mxu1 %v252_v17  ;;  %v166_v16 = vld [vmem:[#allocation10 + $0x298] sm:$0xff]  ;;  %v163_v17 = vld [vmem:[#allocation10 + $0x280] sm:$0xff] }
  0xa6   :  { %651 = vmatpush2.msra.mxu0 %v450_v18  ;;  %722 = vmatpush2.msra.mxu1 %v251_v19  ;;  %v165_v18 = vld [vmem:[#allocation10 + $0x290] sm:$0xff]  ;;  %v158_v19 = vld [vmem:[#allocation10 + $0x258] sm:$0xff] }
  0xa7   :  { %652 = vmatprep.subr.mxu0 %v445_v20  ;;  %723 = vmatprep.subr.mxu1 %v246_v21  ;;  %v157_v20 = vld [vmem:[#allocation10 + $0x250] sm:$0xff]  ;;  %v159_v21 = vld [vmem:[#allocation10 + $0x260] sm:$0xff] }
  0xa8   :  { %653 = vmatpush2.msra.mxu0 %v444_v22  ;;  %724 = vmatpush2.msra.mxu1 %v245_v23  ;;  %v152_v22 = vld [vmem:[#allocation10 + $0x228] sm:$0xff]  ;;  %v154_v23 = vld [vmem:[#allocation10 + $0x238] sm:$0xff] }
  0xa9   :  { %654 = vmatprep.subr.mxu0 %v439_v24  ;;  %725 = vmatprep.subr.mxu1 %v240_v25  ;;  %v151_v24 = vld [vmem:[#allocation10 + $0x220] sm:$0xff]  ;;  %v153_v25 = vld [vmem:[#allocation10 + $0x230] sm:$0xff] }
  0xaa   :  { %655 = vmatpush2.msra.mxu0 %v438_v26  ;;  %726 = vmatpush2.msra.mxu1 %v239_v27  ;;  %v146_v26 = vld [vmem:[#allocation10 + $0x1f8] sm:$0xff]  ;;  %v148_v27 = vld [vmem:[#allocation10 + $0x208] sm:$0xff] }
  0xab   :  { %656 = vmatprep.subr.mxu0 %v433_v28  ;;  %727 = vmatprep.subr.mxu1 %v234_v29  ;;  %v145_v28 = vld [vmem:[#allocation10 + $0x1f0] sm:$0xff]  ;;  %v147_v29 = vld [vmem:[#allocation10 + $0x200] sm:$0xff] }
  0xac   :  { %657 = vmatpush2.msra.mxu0 %v432_v30  ;;  %728 = vmatpush2.msra.mxu1 %v233_v31  ;;  %v140_v30 = vld [vmem:[#allocation10 + $0x1c8] sm:$0xff]  ;;  %v142_v31 = vld [vmem:[#allocation10 + $0x1d8] sm:$0xff] }
  0xad   :  { %658 = vmatprep.subr.mxu0 %v427_v32  ;;  %729 = vmatprep.subr.mxu1 %v228_v33  ;;  %v139_v32 = vld [vmem:[#allocation10 + $0x1c0] sm:$0xff]  ;;  %v141_v33 = vld [vmem:[#allocation10 + $0x1d0] sm:$0xff] }
  0xae   :  { %659 = vmatpush2.msra.mxu0 %v426_v34  ;;  %730 = vmatpush2.msra.mxu1 %v227_v35  ;;  %v134_v34 = vld [vmem:[#allocation10 + $0x198] sm:$0xff]  ;;  %v136_v35 = vld [vmem:[#allocation10 + $0x1a8] sm:$0xff] }
  0xaf   :  { %660 = vmatprep.subr.mxu0 %v421_v36  ;;  %731 = vmatprep.subr.mxu1 %v222_v37  ;;  %v133_v36 = vld [vmem:[#allocation10 + $0x190] sm:$0xff]  ;;  %v135_v37 = vld [vmem:[#allocation10 + $0x1a0] sm:$0xff] }
  0xb0   :  { %661 = vmatpush2.msra.mxu0 %v420_v38  ;;  %732 = vmatpush2.msra.mxu1 %v221_v39  ;;  %v128_v38 = vld [vmem:[#allocation10 + $0x168] sm:$0xff]  ;;  %v130_v39 = vld [vmem:[#allocation10 + $0x178] sm:$0xff] }
  0xb1   :  { %662 = vmatprep.subr.mxu0 %v415_v40  ;;  %733 = vmatprep.subr.mxu1 %v216_v41  ;;  %v127_v40 = vld [vmem:[#allocation10 + $0x160] sm:$0xff]  ;;  %v129_v41 = vld [vmem:[#allocation10 + $0x170] sm:$0xff] }
  0xb2   :  { %663 = vmatpush2.msra.mxu0 %v414_v42  ;;  %734 = vmatpush2.msra.mxu1 %v215_v43  ;;  %v122_v42 = vld [vmem:[#allocation10 + $0x138] sm:$0xff]  ;;  %v124_v43 = vld [vmem:[#allocation10 + $0x148] sm:$0xff] }
  0xb3   :  { %664 = vmatprep.subr.mxu0 %v409_v44  ;;  %735 = vmatprep.subr.mxu1 %v210_v45  ;;  %v121_v44 = vld [vmem:[#allocation10 + $0x130] sm:$0xff]  ;;  %v123_v45 = vld [vmem:[#allocation10 + $0x140] sm:$0xff] }
  0xb4   :  { %665 = vmatpush2.msra.mxu0 %v408_v46  ;;  %736 = vmatpush2.msra.mxu1 %v209_v47  ;;  %v116_v46 = vld [vmem:[#allocation10 + $0x108] sm:$0xff]  ;;  %v118_v47 = vld [vmem:[#allocation10 + $0x118] sm:$0xff] }
  0xb5   :  { %666 = vmatprep.subr.mxu0 %v403_v48  ;;  %737 = vmatprep.subr.mxu1 %v204_v49  ;;  %v115_v48 = vld [vmem:[#allocation10 + $0x100] sm:$0xff]  ;;  %v117_v49 = vld [vmem:[#allocation10 + $0x110] sm:$0xff] }
  0xb6   :  { %667 = vmatpush2.msra.mxu0 %v402_v50  ;;  %738 = vmatpush2.msra.mxu1 %v203_v51  ;;  %v110_v50 = vld [vmem:[#allocation10 + $0xd8] sm:$0xff]  ;;  %v112_v51 = vld [vmem:[#allocation10 + $0xe8] sm:$0xff] }
  0xb7   :  { %668 = vmatprep.subr.mxu0 %v397_v52  ;;  %739 = vmatprep.subr.mxu1 %v198_v53  ;;  %v109_v52 = vld [vmem:[#allocation10 + $0xd0] sm:$0xff]  ;;  %v111_v53 = vld [vmem:[#allocation10 + $0xe0] sm:$0xff] }
  0xb8   :  { %669 = vmatpush2.msra.mxu0 %v396_v54  ;;  %740 = vmatpush2.msra.mxu1 %v197_v55  ;;  %v104_v54 = vld [vmem:[#allocation10 + $0xa8] sm:$0xff]  ;;  %v106_v55 = vld [vmem:[#allocation10 + $0xb8] sm:$0xff] }
  0xb9   :  { %670 = vmatprep.subr.mxu0 %v391_v56  ;;  %741 = vmatprep.subr.mxu1 %v192_v57  ;;  %v103_v56 = vld [vmem:[#allocation10 + $0xa0] sm:$0xff]  ;;  %v105_v57 = vld [vmem:[#allocation10 + $0xb0] sm:$0xff] }
  0xba   :  { %671 = vmatpush2.msra.mxu0 %v390_v58  ;;  %742 = vmatpush2.msra.mxu1 %v191_v59  ;;  %v98_v58 = vld [vmem:[#allocation10 + $0x78] sm:$0xff]  ;;  %v100_v59 = vld [vmem:[#allocation10 + $0x88] sm:$0xff] }
  0xbb   :  { %672 = vmatprep.subr.mxu0 %v385_v60  ;;  %743 = vmatprep.subr.mxu1 %v186_v61  ;;  %v97_v60 = vld [vmem:[#allocation10 + $0x70] sm:$0xff]  ;;  %v99_v61 = vld [vmem:[#allocation10 + $0x80] sm:$0xff] }
  0xbc   :  { %673 = vmatpush2.msra.mxu0 %v384_v62  ;;  %744 = vmatpush2.msra.mxu1 %v185_v0  ;;  %v92_v62 = vld [vmem:[#allocation10 + $0x48] sm:$0xff]  ;;  %v94_v0 = vld [vmem:[#allocation10 + $0x58] sm:$0xff] }
  0xbd   :  { %674 = vmatprep.subr.mxu0 %v379_v2  ;;  %745 = vmatprep.subr.mxu1 %v180_v3  ;;  %v91_v2 = vld [vmem:[#allocation10 + $0x40] sm:$0xff]  ;;  %v93_v3 = vld [vmem:[#allocation10 + $0x50] sm:$0xff] }
  0xbe   :  { %675 = vmatpush2.msra.mxu0 %v378_v4  ;;  %676 = vmatprep.mubr.f32.mxu0 %v1936_v63  ;;  %v164_v63 = vld [vmem:[#allocation10 + $0x288] sm:$0xff]  ;;  %v86_v4 = vld [vmem:[#allocation10 + $0x18] sm:$0xff] }
  0xbf   :  { %746 = vmatpush2.msra.mxu1 %v179_v5  ;;  %747 = vmatprep.mubr.f32.mxu1 %v1944_v6  ;;  %v88_v5 = vld [vmem:[#allocation10 + $0x28] sm:$0xff] }
  0xc0   :  { %677 = vmatmul.mubr.f32.vlgmr.msra.gmra.mxu0 %v1938_v1  ;;  %748 = vmatmul.mubr.f32.vlgmr.msra.gmra.mxu1 %v1946_v7  ;;  %v160_v1 = vld [vmem:[#allocation10 + $0x268] sm:$0xff] }
  0xc1   :  { %754 = vmatprep.subr.mxu0 %v176_v8  ;;  %825 = vmatprep.subr.mxu1 %v178_v9  ;;  %v85_v8 = vld [vmem:[#allocation10 + $0x10] sm:$0xff]  ;;  %v87_v9 = vld [vmem:[#allocation10 + $0x20] sm:$0xff] }
  0xc2   :  { %755 = vmatpush1.msra.mxu0 %v175_v10  ;;  %826 = vmatpush1.msra.mxu1 %v177_v11  ;;  %v272_v10 = vld [vmem:[#allocation10 + $0x5e8] sm:$0xff]  ;;  %v274_v11 = vld [vmem:[#allocation10 + $0x5f8] sm:$0xff] }
  0xc3   :  { %756 = vmatprep.subr.mxu0 %v170_v12  ;;  %827 = vmatprep.subr.mxu1 %v172_v13  ;;  %v271_v12 = vld [vmem:[#allocation10 + $0x5e0] sm:$0xff]  ;;  %v273_v13 = vld [vmem:[#allocation10 + $0x5f0] sm:$0xff] }
  0xc4   :  { %757 = vmatpush1.msra.mxu0 %v169_v14  ;;  %828 = vmatpush1.msra.mxu1 %v171_v15  ;;  %v266_v14 = vld [vmem:[#allocation10 + $0x5b8] sm:$0xff]  ;;  %v268_v15 = vld [vmem:[#allocation10 + $0x5c8] sm:$0xff] }
  0xc5   :  { %758 = vmatprep.subr.mxu0 %v164_v63  ;;  %829 = vmatprep.subr.mxu1 %v166_v16  ;;  %v265_v63 = vld [vmem:[#allocation10 + $0x5b0] sm:$0xff]  ;;  %v267_v16 = vld [vmem:[#allocation10 + $0x5c0] sm:$0xff] }
  0xc6   :  { %759 = vmatpush1.msra.mxu0 %v163_v17  ;;  %830 = vmatpush1.msra.mxu1 %v165_v18  ;;  %v260_v17 = vld [vmem:[#allocation10 + $0x588] sm:$0xff]  ;;  %v262_v18 = vld [vmem:[#allocation10 + $0x598] sm:$0xff] }
  0xc7   :  { %760 = vmatprep.subr.mxu0 %v158_v19  ;;  %831 = vmatprep.subr.mxu1 %v160_v1  ;;  %v259_v19 = vld [vmem:[#allocation10 + $0x580] sm:$0xff]  ;;  %v261_v1 = vld [vmem:[#allocation10 + $0x590] sm:$0xff] }
  0xc8   :  { %761 = vmatpush1.msra.mxu0 %v157_v20  ;;  %832 = vmatpush1.msra.mxu1 %v159_v21  ;;  %v254_v20 = vld [vmem:[#allocation10 + $0x558] sm:$0xff]  ;;  %v256_v21 = vld [vmem:[#allocation10 + $0x568] sm:$0xff] }
  0xc9   :  { %762 = vmatprep.subr.mxu0 %v152_v22  ;;  %833 = vmatprep.subr.mxu1 %v154_v23  ;;  %v253_v22 = vld [vmem:[#allocation10 + $0x550] sm:$0xff]  ;;  %v255_v23 = vld [vmem:[#allocation10 + $0x560] sm:$0xff] }
  0xca   :  { %763 = vmatpush1.msra.mxu0 %v151_v24  ;;  %834 = vmatpush1.msra.mxu1 %v153_v25  ;;  %v248_v24 = vld [vmem:[#allocation10 + $0x528] sm:$0xff]  ;;  %v250_v25 = vld [vmem:[#allocation10 + $0x538] sm:$0xff] }
  0xcb   :  { %764 = vmatprep.subr.mxu0 %v146_v26  ;;  %835 = vmatprep.subr.mxu1 %v148_v27  ;;  %v247_v26 = vld [vmem:[#allocation10 + $0x520] sm:$0xff]  ;;  %v249_v27 = vld [vmem:[#allocation10 + $0x530] sm:$0xff] }
  0xcc   :  { %765 = vmatpush1.msra.mxu0 %v145_v28  ;;  %836 = vmatpush1.msra.mxu1 %v147_v29  ;;  %v242_v28 = vld [vmem:[#allocation10 + $0x4f8] sm:$0xff]  ;;  %v244_v29 = vld [vmem:[#allocation10 + $0x508] sm:$0xff] }
  0xcd   :  { %766 = vmatprep.subr.mxu0 %v140_v30  ;;  %837 = vmatprep.subr.mxu1 %v142_v31  ;;  %v241_v30 = vld [vmem:[#allocation10 + $0x4f0] sm:$0xff]  ;;  %v243_v31 = vld [vmem:[#allocation10 + $0x500] sm:$0xff] }
  0xce   :  { %767 = vmatpush1.msra.mxu0 %v139_v32  ;;  %838 = vmatpush1.msra.mxu1 %v141_v33  ;;  %v236_v32 = vld [vmem:[#allocation10 + $0x4c8] sm:$0xff]  ;;  %v238_v33 = vld [vmem:[#allocation10 + $0x4d8] sm:$0xff] }
  0xcf   :  { %768 = vmatprep.subr.mxu0 %v134_v34  ;;  %839 = vmatprep.subr.mxu1 %v136_v35  ;;  %v235_v34 = vld [vmem:[#allocation10 + $0x4c0] sm:$0xff]  ;;  %v237_v35 = vld [vmem:[#allocation10 + $0x4d0] sm:$0xff] }
  0xd0   :  { %769 = vmatpush1.msra.mxu0 %v133_v36  ;;  %840 = vmatpush1.msra.mxu1 %v135_v37  ;;  %v230_v36 = vld [vmem:[#allocation10 + $0x498] sm:$0xff]  ;;  %v232_v37 = vld [vmem:[#allocation10 + $0x4a8] sm:$0xff] }
  0xd1   :  { %770 = vmatprep.subr.mxu0 %v128_v38  ;;  %841 = vmatprep.subr.mxu1 %v130_v39  ;;  %v229_v38 = vld [vmem:[#allocation10 + $0x490] sm:$0xff]  ;;  %v231_v39 = vld [vmem:[#allocation10 + $0x4a0] sm:$0xff] }
  0xd2   :  { %771 = vmatpush1.msra.mxu0 %v127_v40  ;;  %842 = vmatpush1.msra.mxu1 %v129_v41  ;;  %v224_v40 = vld [vmem:[#allocation10 + $0x468] sm:$0xff]  ;;  %v226_v41 = vld [vmem:[#allocation10 + $0x478] sm:$0xff] }
  0xd3   :  { %772 = vmatprep.subr.mxu0 %v122_v42  ;;  %843 = vmatprep.subr.mxu1 %v124_v43  ;;  %v223_v42 = vld [vmem:[#allocation10 + $0x460] sm:$0xff]  ;;  %v225_v43 = vld [vmem:[#allocation10 + $0x470] sm:$0xff] }
  0xd4   :  { %773 = vmatpush1.msra.mxu0 %v121_v44  ;;  %844 = vmatpush1.msra.mxu1 %v123_v45  ;;  %v218_v44 = vld [vmem:[#allocation10 + $0x438] sm:$0xff]  ;;  %v220_v45 = vld [vmem:[#allocation10 + $0x448] sm:$0xff] }
  0xd5   :  { %774 = vmatprep.subr.mxu0 %v116_v46  ;;  %845 = vmatprep.subr.mxu1 %v118_v47  ;;  %v217_v46 = vld [vmem:[#allocation10 + $0x430] sm:$0xff]  ;;  %v219_v47 = vld [vmem:[#allocation10 + $0x440] sm:$0xff] }
  0xd6   :  { %775 = vmatpush1.msra.mxu0 %v115_v48  ;;  %846 = vmatpush1.msra.mxu1 %v117_v49  ;;  %v212_v48 = vld [vmem:[#allocation10 + $0x408] sm:$0xff]  ;;  %v214_v49 = vld [vmem:[#allocation10 + $0x418] sm:$0xff] }
  0xd7   :  { %776 = vmatprep.subr.mxu0 %v110_v50  ;;  %847 = vmatprep.subr.mxu1 %v112_v51  ;;  %v211_v50 = vld [vmem:[#allocation10 + $0x400] sm:$0xff]  ;;  %v213_v51 = vld [vmem:[#allocation10 + $0x410] sm:$0xff] }
  0xd8   :  { %777 = vmatpush1.msra.mxu0 %v109_v52  ;;  %848 = vmatpush1.msra.mxu1 %v111_v53  ;;  %v206_v52 = vld [vmem:[#allocation10 + $0x3d8] sm:$0xff]  ;;  %v208_v53 = vld [vmem:[#allocation10 + $0x3e8] sm:$0xff] }
  0xd9   :  { %778 = vmatprep.subr.mxu0 %v104_v54  ;;  %849 = vmatprep.subr.mxu1 %v106_v55  ;;  %v205_v54 = vld [vmem:[#allocation10 + $0x3d0] sm:$0xff]  ;;  %v207_v55 = vld [vmem:[#allocation10 + $0x3e0] sm:$0xff] }
  0xda   :  { %779 = vmatpush1.msra.mxu0 %v103_v56  ;;  %850 = vmatpush1.msra.mxu1 %v105_v57  ;;  %v200_v56 = vld [vmem:[#allocation10 + $0x3a8] sm:$0xff]  ;;  %v202_v57 = vld [vmem:[#allocation10 + $0x3b8] sm:$0xff] }
  0xdb   :  { %780 = vmatprep.subr.mxu0 %v98_v58  ;;  %851 = vmatprep.subr.mxu1 %v100_v59  ;;  %v199_v58 = vld [vmem:[#allocation10 + $0x3a0] sm:$0xff]  ;;  %v201_v59 = vld [vmem:[#allocation10 + $0x3b0] sm:$0xff] }
  0xdc   :  { %781 = vmatpush1.msra.mxu0 %v97_v60  ;;  %852 = vmatpush1.msra.mxu1 %v99_v61  ;;  %v194_v60 = vld [vmem:[#allocation10 + $0x378] sm:$0xff]  ;;  %v196_v61 = vld [vmem:[#allocation10 + $0x388] sm:$0xff] }
  0xdd   :  { %782 = vmatprep.subr.mxu0 %v92_v62  ;;  %853 = vmatprep.subr.mxu1 %v94_v0  ;;  %v193_v62 = vld [vmem:[#allocation10 + $0x370] sm:$0xff]  ;;  %v195_v0 = vld [vmem:[#allocation10 + $0x380] sm:$0xff] }
  0xde   :  { %783 = vmatpush1.msra.mxu0 %v91_v2  ;;  %854 = vmatpush1.msra.mxu1 %v93_v3  ;;  %v188_v2 = vld [vmem:[#allocation10 + $0x348] sm:$0xff]  ;;  %v190_v3 = vld [vmem:[#allocation10 + $0x358] sm:$0xff] }
  0xdf   :  { %784 = vmatprep.subr.mxu0 %v86_v4  ;;  %855 = vmatprep.subr.mxu1 %v88_v5  ;;  %v187_v4 = vld [vmem:[#allocation10 + $0x340] sm:$0xff]  ;;  %v189_v5 = vld [vmem:[#allocation10 + $0x350] sm:$0xff] }
  0xe0   :  { %785 = vmatpush1.msra.mxu0 %v85_v8  ;;  %856 = vmatpush1.msra.mxu1 %v87_v9  ;;  %v182_v8 = vld [vmem:[#allocation10 + $0x318] sm:$0xff]  ;;  %v184_v9 = vld [vmem:[#allocation10 + $0x328] sm:$0xff] }
  0xe1   :  { %786 = vmatprep.subr.mxu0 %v272_v10  ;;  %857 = vmatprep.subr.mxu1 %v274_v11  ;;  %v181_v10 = vld [vmem:[#allocation10 + $0x310] sm:$0xff]  ;;  %v183_v11 = vld [vmem:[#allocation10 + $0x320] sm:$0xff] }
  0xe2   :  { %787 = vmatpush2.msra.mxu0 %v271_v12  ;;  %858 = vmatpush2.msra.mxu1 %v273_v13  ;;  %v990_v12 = vld [vmem:[#allocation10 + $0xed8] sm:$0xff]  ;;  %v992_v13 = vld [vmem:[#allocation10 + $0xee8] sm:$0xff] }
  0xe3   :  { %788 = vmatprep.subr.mxu0 %v266_v14  ;;  %859 = vmatprep.subr.mxu1 %v268_v15  ;;  %v989_v14 = vld [vmem:[#allocation10 + $0xed0] sm:$0xff]  ;;  %v991_v15 = vld [vmem:[#allocation10 + $0xee0] sm:$0xff] }
  0xe4   :  { %789 = vmatpush2.msra.mxu0 %v265_v63  ;;  %860 = vmatpush2.msra.mxu1 %v267_v16  ;;  %v984_v63 = vld [vmem:[#allocation10 + $0xea8] sm:$0xff]  ;;  %v986_v16 = vld [vmem:[#allocation10 + $0xeb8] sm:$0xff] }
  0xe5   :  { %790 = vmatprep.subr.mxu0 %v260_v17  ;;  %861 = vmatprep.subr.mxu1 %v262_v18  ;;  %v983_v17 = vld [vmem:[#allocation10 + $0xea0] sm:$0xff]  ;;  %v985_v18 = vld [vmem:[#allocation10 + $0xeb0] sm:$0xff] }
  0xe6   :  { %791 = vmatpush2.msra.mxu0 %v259_v19  ;;  %862 = vmatpush2.msra.mxu1 %v261_v1  ;;  %v978_v19 = vld [vmem:[#allocation10 + $0xe78] sm:$0xff]  ;;  %v980_v1 = vld [vmem:[#allocation10 + $0xe88] sm:$0xff] }
  0xe7   :  { %792 = vmatprep.subr.mxu0 %v254_v20  ;;  %863 = vmatprep.subr.mxu1 %v256_v21  ;;  %v977_v20 = vld [vmem:[#allocation10 + $0xe70] sm:$0xff]  ;;  %v972_v21 = vld [vmem:[#allocation10 + $0xe48] sm:$0xff] }
  0xe8   :  { %793 = vmatpush2.msra.mxu0 %v253_v22  ;;  %864 = vmatpush2.msra.mxu1 %v255_v23  ;;  %v974_v22 = vld [vmem:[#allocation10 + $0xe58] sm:$0xff]  ;;  %v973_v23 = vld [vmem:[#allocation10 + $0xe50] sm:$0xff] }
  0xe9   :  { %794 = vmatprep.subr.mxu0 %v248_v24  ;;  %865 = vmatprep.subr.mxu1 %v250_v25  ;;  %v966_v24 = vld [vmem:[#allocation10 + $0xe18] sm:$0xff]  ;;  %v968_v25 = vld [vmem:[#allocation10 + $0xe28] sm:$0xff] }
  0xea   :  { %795 = vmatpush2.msra.mxu0 %v247_v26  ;;  %866 = vmatpush2.msra.mxu1 %v249_v27  ;;  %v965_v26 = vld [vmem:[#allocation10 + $0xe10] sm:$0xff]  ;;  %v967_v27 = vld [vmem:[#allocation10 + $0xe20] sm:$0xff] }
  0xeb   :  { %796 = vmatprep.subr.mxu0 %v242_v28  ;;  %867 = vmatprep.subr.mxu1 %v244_v29  ;;  %v960_v28 = vld [vmem:[#allocation10 + $0xde8] sm:$0xff]  ;;  %v962_v29 = vld [vmem:[#allocation10 + $0xdf8] sm:$0xff] }
  0xec   :  { %797 = vmatpush2.msra.mxu0 %v241_v30  ;;  %868 = vmatpush2.msra.mxu1 %v243_v31  ;;  %v959_v30 = vld [vmem:[#allocation10 + $0xde0] sm:$0xff]  ;;  %v961_v31 = vld [vmem:[#allocation10 + $0xdf0] sm:$0xff] }
  0xed   :  { %798 = vmatprep.subr.mxu0 %v236_v32  ;;  %869 = vmatprep.subr.mxu1 %v238_v33  ;;  %v954_v32 = vld [vmem:[#allocation10 + $0xdb8] sm:$0xff]  ;;  %v956_v33 = vld [vmem:[#allocation10 + $0xdc8] sm:$0xff] }
  0xee   :  { %799 = vmatpush2.msra.mxu0 %v235_v34  ;;  %870 = vmatpush2.msra.mxu1 %v237_v35  ;;  %v953_v34 = vld [vmem:[#allocation10 + $0xdb0] sm:$0xff]  ;;  %v955_v35 = vld [vmem:[#allocation10 + $0xdc0] sm:$0xff] }
  0xef   :  { %800 = vmatprep.subr.mxu0 %v230_v36  ;;  %871 = vmatprep.subr.mxu1 %v232_v37  ;;  %v948_v36 = vld [vmem:[#allocation10 + $0xd88] sm:$0xff]  ;;  %v950_v37 = vld [vmem:[#allocation10 + $0xd98] sm:$0xff] }
  0xf0   :  { %801 = vmatpush2.msra.mxu0 %v229_v38  ;;  %872 = vmatpush2.msra.mxu1 %v231_v39  ;;  %v947_v38 = vld [vmem:[#allocation10 + $0xd80] sm:$0xff]  ;;  %v949_v39 = vld [vmem:[#allocation10 + $0xd90] sm:$0xff] }
  0xf1   :  { %802 = vmatprep.subr.mxu0 %v224_v40  ;;  %873 = vmatprep.subr.mxu1 %v226_v41  ;;  %v942_v40 = vld [vmem:[#allocation10 + $0xd58] sm:$0xff]  ;;  %v944_v41 = vld [vmem:[#allocation10 + $0xd68] sm:$0xff] }
  0xf2   :  { %803 = vmatpush2.msra.mxu0 %v223_v42  ;;  %874 = vmatpush2.msra.mxu1 %v225_v43  ;;  %v941_v42 = vld [vmem:[#allocation10 + $0xd50] sm:$0xff]  ;;  %v943_v43 = vld [vmem:[#allocation10 + $0xd60] sm:$0xff] }
  0xf3   :  { %804 = vmatprep.subr.mxu0 %v218_v44  ;;  %875 = vmatprep.subr.mxu1 %v220_v45  ;;  %v936_v44 = vld [vmem:[#allocation10 + $0xd28] sm:$0xff]  ;;  %v938_v45 = vld [vmem:[#allocation10 + $0xd38] sm:$0xff] }
  0xf4   :  { %805 = vmatpush2.msra.mxu0 %v217_v46  ;;  %876 = vmatpush2.msra.mxu1 %v219_v47  ;;  %v935_v46 = vld [vmem:[#allocation10 + $0xd20] sm:$0xff]  ;;  %v937_v47 = vld [vmem:[#allocation10 + $0xd30] sm:$0xff] }
  0xf5   :  { %806 = vmatprep.subr.mxu0 %v212_v48  ;;  %877 = vmatprep.subr.mxu1 %v214_v49  ;;  %v930_v48 = vld [vmem:[#allocation10 + $0xcf8] sm:$0xff]  ;;  %v932_v49 = vld [vmem:[#allocation10 + $0xd08] sm:$0xff] }
  0xf6   :  { %807 = vmatpush2.msra.mxu0 %v211_v50  ;;  %878 = vmatpush2.msra.mxu1 %v213_v51  ;;  %v929_v50 = vld [vmem:[#allocation10 + $0xcf0] sm:$0xff]  ;;  %v931_v51 = vld [vmem:[#allocation10 + $0xd00] sm:$0xff] }
  0xf7   :  { %808 = vmatprep.subr.mxu0 %v206_v52  ;;  %879 = vmatprep.subr.mxu1 %v208_v53  ;;  %v924_v52 = vld [vmem:[#allocation10 + $0xcc8] sm:$0xff]  ;;  %v926_v53 = vld [vmem:[#allocation10 + $0xcd8] sm:$0xff] }
  0xf8   :  { %809 = vmatpush2.msra.mxu0 %v205_v54  ;;  %880 = vmatpush2.msra.mxu1 %v207_v55  ;;  %v923_v54 = vld [vmem:[#allocation10 + $0xcc0] sm:$0xff]  ;;  %v925_v55 = vld [vmem:[#allocation10 + $0xcd0] sm:$0xff] }
  0xf9   :  { %810 = vmatprep.subr.mxu0 %v200_v56  ;;  %881 = vmatprep.subr.mxu1 %v202_v57  ;;  %v918_v56 = vld [vmem:[#allocation10 + $0xc98] sm:$0xff]  ;;  %v920_v57 = vld [vmem:[#allocation10 + $0xca8] sm:$0xff] }
  0xfa   :  { %811 = vmatpush2.msra.mxu0 %v199_v58  ;;  %882 = vmatpush2.msra.mxu1 %v201_v59  ;;  %v917_v58 = vld [vmem:[#allocation10 + $0xc90] sm:$0xff]  ;;  %v919_v59 = vld [vmem:[#allocation10 + $0xca0] sm:$0xff] }
  0xfb   :  { %812 = vmatprep.subr.mxu0 %v194_v60  ;;  %883 = vmatprep.subr.mxu1 %v196_v61  ;;  %v912_v60 = vld [vmem:[#allocation10 + $0xc68] sm:$0xff]  ;;  %v914_v61 = vld [vmem:[#allocation10 + $0xc78] sm:$0xff] }
  0xfc   :  { %813 = vmatpush2.msra.mxu0 %v193_v62  ;;  %884 = vmatpush2.msra.mxu1 %v195_v0  ;;  %v911_v62 = vld [vmem:[#allocation10 + $0xc60] sm:$0xff]  ;;  %v913_v0 = vld [vmem:[#allocation10 + $0xc70] sm:$0xff] }
  0xfd   :  { %814 = vmatprep.subr.mxu0 %v188_v2  ;;  %885 = vmatprep.subr.mxu1 %v190_v3  ;;  %v906_v2 = vld [vmem:[#allocation10 + $0xc38] sm:$0xff]  ;;  %v908_v3 = vld [vmem:[#allocation10 + $0xc48] sm:$0xff] }
  0xfe   :  { %815 = vmatpush2.msra.mxu0 %v187_v4  ;;  %886 = vmatpush2.msra.mxu1 %v189_v5  ;;  %v905_v4 = vld [vmem:[#allocation10 + $0xc30] sm:$0xff]  ;;  %v907_v5 = vld [vmem:[#allocation10 + $0xc40] sm:$0xff] }
  0xff   :  { %816 = vmatprep.subr.mxu0 %v182_v8  ;;  %887 = vmatprep.subr.mxu1 %v184_v9  ;;  %v900_v8 = vld [vmem:[#allocation10 + $0xc08] sm:$0xff]  ;;  %v902_v9 = vld [vmem:[#allocation10 + $0xc18] sm:$0xff] }
 0x100   :  { %817 = vmatpush2.msra.mxu0 %v181_v10  ;;  %818 = vmatprep.mubr.f32.mxu0 %v1944_v6  ;;  %v899_v10 = vld [vmem:[#allocation10 + $0xc00] sm:$0xff] }
 0x101   :  { %888 = vmatpush2.msra.mxu1 %v183_v11  ;;  %889 = vmatprep.mubr.f32.mxu1 %v1944_v6  ;;  %v979_v6 = vld [vmem:[#allocation10 + $0xe80] sm:$0xff]  ;;  %v901_v11 = vld [vmem:[#allocation10 + $0xc10] sm:$0xff] }
 0x102   :  { %819 = vmatmul.mubr.f32.vlgmr.msra.gmra.mxu0 %v1946_v7  ;;  %890 = vmatmul.mubr.f32.vlgmr.msra.gmra.mxu1 %v1946_v7  ;;  %v971_v7 = vld [vmem:[#allocation10 + $0xe40] sm:$0xff] }
 0x103   :  { %1091 = vmatprep.subr.mxu0 %v990_v12  ;;  %1162 = vmatprep.subr.mxu1 %v992_v13  ;;  %v1086_v12 = vld [vmem:[#allocation10 + $0x11d8] sm:$0xff]  ;;  %v1088_v13 = vld [vmem:[#allocation10 + $0x11e8] sm:$0xff] }
 0x104   :  { %1092 = vmatpush1.msra.mxu0 %v989_v14  ;;  %1163 = vmatpush1.msra.mxu1 %v991_v15  ;;  %v1085_v14 = vld [vmem:[#allocation10 + $0x11d0] sm:$0xff]  ;;  %v1087_v15 = vld [vmem:[#allocation10 + $0x11e0] sm:$0xff] }
 0x105   :  { %1093 = vmatprep.subr.mxu0 %v984_v63  ;;  %1164 = vmatprep.subr.mxu1 %v986_v16  ;;  %v1080_v63 = vld [vmem:[#allocation10 + $0x11a8] sm:$0xff]  ;;  %v1082_v16 = vld [vmem:[#allocation10 + $0x11b8] sm:$0xff] }
 0x106   :  { %1094 = vmatpush1.msra.mxu0 %v983_v17  ;;  %1165 = vmatpush1.msra.mxu1 %v985_v18  ;;  %v1079_v17 = vld [vmem:[#allocation10 + $0x11a0] sm:$0xff]  ;;  %v1081_v18 = vld [vmem:[#allocation10 + $0x11b0] sm:$0xff] }
 0x107   :  { %1095 = vmatprep.subr.mxu0 %v978_v19  ;;  %1166 = vmatprep.subr.mxu1 %v980_v1  ;;  %v1074_v19 = vld [vmem:[#allocation10 + $0x1178] sm:$0xff]  ;;  %v1076_v1 = vld [vmem:[#allocation10 + $0x1188] sm:$0xff] }
 0x108   :  { %1096 = vmatpush1.msra.mxu0 %v977_v20  ;;  %1167 = vmatpush1.msra.mxu1 %v979_v6  ;;  %v1073_v20 = vld [vmem:[#allocation10 + $0x1170] sm:$0xff]  ;;  %v1075_v6 = vld [vmem:[#allocation10 + $0x1180] sm:$0xff] }
 0x109   :  { %1097 = vmatprep.subr.mxu0 %v972_v21  ;;  %1168 = vmatprep.subr.mxu1 %v974_v22  ;;  %v1068_v21 = vld [vmem:[#allocation10 + $0x1148] sm:$0xff]  ;;  %v1070_v22 = vld [vmem:[#allocation10 + $0x1158] sm:$0xff] }
 0x10a   :  { %1098 = vmatpush1.msra.mxu0 %v971_v7  ;;  %1169 = vmatpush1.msra.mxu1 %v973_v23  ;;  %v1067_v7 = vld [vmem:[#allocation10 + $0x1140] sm:$0xff]  ;;  %v1069_v23 = vld [vmem:[#allocation10 + $0x1150] sm:$0xff] }
 0x10b   :  { %1099 = vmatprep.subr.mxu0 %v966_v24  ;;  %1170 = vmatprep.subr.mxu1 %v968_v25  ;;  %v1062_v24 = vld [vmem:[#allocation10 + $0x1118] sm:$0xff]  ;;  %v1064_v25 = vld [vmem:[#allocation10 + $0x1128] sm:$0xff] }
 0x10c   :  { %1100 = vmatpush1.msra.mxu0 %v965_v26  ;;  %1171 = vmatpush1.msra.mxu1 %v967_v27  ;;  %v1061_v26 = vld [vmem:[#allocation10 + $0x1110] sm:$0xff]  ;;  %v1063_v27 = vld [vmem:[#allocation10 + $0x1120] sm:$0xff] }
 0x10d   :  { %1101 = vmatprep.subr.mxu0 %v960_v28  ;;  %1172 = vmatprep.subr.mxu1 %v962_v29  ;;  %v1056_v28 = vld [vmem:[#allocation10 + $0x10e8] sm:$0xff]  ;;  %v1058_v29 = vld [vmem:[#allocation10 + $0x10f8] sm:$0xff] }
 0x10e   :  { %1102 = vmatpush1.msra.mxu0 %v959_v30  ;;  %1173 = vmatpush1.msra.mxu1 %v961_v31  ;;  %v1055_v30 = vld [vmem:[#allocation10 + $0x10e0] sm:$0xff]  ;;  %v1057_v31 = vld [vmem:[#allocation10 + $0x10f0] sm:$0xff] }
 0x10f   :  { %1103 = vmatprep.subr.mxu0 %v954_v32  ;;  %1174 = vmatprep.subr.mxu1 %v956_v33  ;;  %v1050_v32 = vld [vmem:[#allocation10 + $0x10b8] sm:$0xff]  ;;  %v1052_v33 = vld [vmem:[#allocation10 + $0x10c8] sm:$0xff] }
 0x110   :  { %1104 = vmatpush1.msra.mxu0 %v953_v34  ;;  %1175 = vmatpush1.msra.mxu1 %v955_v35  ;;  %v1049_v34 = vld [vmem:[#allocation10 + $0x10b0] sm:$0xff]  ;;  %v1051_v35 = vld [vmem:[#allocation10 + $0x10c0] sm:$0xff] }
 0x111   :  { %1105 = vmatprep.subr.mxu0 %v948_v36  ;;  %1176 = vmatprep.subr.mxu1 %v950_v37  ;;  %v1044_v36 = vld [vmem:[#allocation10 + $0x1088] sm:$0xff]  ;;  %v1046_v37 = vld [vmem:[#allocation10 + $0x1098] sm:$0xff] }
 0x112   :  { %1106 = vmatpush1.msra.mxu0 %v947_v38  ;;  %1177 = vmatpush1.msra.mxu1 %v949_v39  ;;  %v1043_v38 = vld [vmem:[#allocation10 + $0x1080] sm:$0xff]  ;;  %v1045_v39 = vld [vmem:[#allocation10 + $0x1090] sm:$0xff] }
 0x113   :  { %1107 = vmatprep.subr.mxu0 %v942_v40  ;;  %1178 = vmatprep.subr.mxu1 %v944_v41  ;;  %v1038_v40 = vld [vmem:[#allocation10 + $0x1058] sm:$0xff]  ;;  %v1040_v41 = vld [vmem:[#allocation10 + $0x1068] sm:$0xff] }
 0x114   :  { %1108 = vmatpush1.msra.mxu0 %v941_v42  ;;  %1179 = vmatpush1.msra.mxu1 %v943_v43  ;;  %v1037_v42 = vld [vmem:[#allocation10 + $0x1050] sm:$0xff]  ;;  %v1039_v43 = vld [vmem:[#allocation10 + $0x1060] sm:$0xff] }
 0x115   :  { %1109 = vmatprep.subr.mxu0 %v936_v44  ;;  %1180 = vmatprep.subr.mxu1 %v938_v45  ;;  %v1032_v44 = vld [vmem:[#allocation10 + $0x1028] sm:$0xff]  ;;  %v1034_v45 = vld [vmem:[#allocation10 + $0x1038] sm:$0xff] }
 0x116   :  { %1110 = vmatpush1.msra.mxu0 %v935_v46  ;;  %1181 = vmatpush1.msra.mxu1 %v937_v47  ;;  %v1031_v46 = vld [vmem:[#allocation10 + $0x1020] sm:$0xff]  ;;  %v1033_v47 = vld [vmem:[#allocation10 + $0x1030] sm:$0xff] }
 0x117   :  { %1111 = vmatprep.subr.mxu0 %v930_v48  ;;  %1182 = vmatprep.subr.mxu1 %v932_v49  ;;  %v1026_v48 = vld [vmem:[#allocation10 + $0xff8] sm:$0xff]  ;;  %v1028_v49 = vld [vmem:[#allocation10 + $0x1008] sm:$0xff] }
 0x118   :  { %1112 = vmatpush1.msra.mxu0 %v929_v50  ;;  %1183 = vmatpush1.msra.mxu1 %v931_v51  ;;  %v1025_v50 = vld [vmem:[#allocation10 + $0xff0] sm:$0xff]  ;;  %v1027_v51 = vld [vmem:[#allocation10 + $0x1000] sm:$0xff] }
 0x119   :  { %1113 = vmatprep.subr.mxu0 %v924_v52  ;;  %1184 = vmatprep.subr.mxu1 %v926_v53  ;;  %v1020_v52 = vld [vmem:[#allocation10 + $0xfc8] sm:$0xff]  ;;  %v1022_v53 = vld [vmem:[#allocation10 + $0xfd8] sm:$0xff] }
 0x11a   :  { %1114 = vmatpush1.msra.mxu0 %v923_v54  ;;  %1185 = vmatpush1.msra.mxu1 %v925_v55  ;;  %v1019_v54 = vld [vmem:[#allocation10 + $0xfc0] sm:$0xff]  ;;  %v1021_v55 = vld [vmem:[#allocation10 + $0xfd0] sm:$0xff] }
 0x11b   :  { %1115 = vmatprep.subr.mxu0 %v918_v56  ;;  %1186 = vmatprep.subr.mxu1 %v920_v57  ;;  %v1014_v56 = vld [vmem:[#allocation10 + $0xf98] sm:$0xff]  ;;  %v1016_v57 = vld [vmem:[#allocation10 + $0xfa8] sm:$0xff] }
 0x11c   :  { %1116 = vmatpush1.msra.mxu0 %v917_v58  ;;  %1187 = vmatpush1.msra.mxu1 %v919_v59  ;;  %v1013_v58 = vld [vmem:[#allocation10 + $0xf90] sm:$0xff]  ;;  %v1015_v59 = vld [vmem:[#allocation10 + $0xfa0] sm:$0xff] }
 0x11d   :  { %1117 = vmatprep.subr.mxu0 %v912_v60  ;;  %1188 = vmatprep.subr.mxu1 %v914_v61  ;;  %v1008_v60 = vld [vmem:[#allocation10 + $0xf68] sm:$0xff]  ;;  %v1010_v61 = vld [vmem:[#allocation10 + $0xf78] sm:$0xff] }
 0x11e   :  { %1118 = vmatpush1.msra.mxu0 %v911_v62  ;;  %1189 = vmatpush1.msra.mxu1 %v913_v0  ;;  %v1007_v62 = vld [vmem:[#allocation10 + $0xf60] sm:$0xff]  ;;  %v1009_v0 = vld [vmem:[#allocation10 + $0xf70] sm:$0xff] }
 0x11f   :  { %1119 = vmatprep.subr.mxu0 %v906_v2  ;;  %1190 = vmatprep.subr.mxu1 %v908_v3  ;;  %v1002_v2 = vld [vmem:[#allocation10 + $0xf38] sm:$0xff]  ;;  %v1004_v3 = vld [vmem:[#allocation10 + $0xf48] sm:$0xff] }
 0x120   :  { %1120 = vmatpush1.msra.mxu0 %v905_v4  ;;  %1191 = vmatpush1.msra.mxu1 %v907_v5  ;;  %v1001_v4 = vld [vmem:[#allocation10 + $0xf30] sm:$0xff]  ;;  %v1003_v5 = vld [vmem:[#allocation10 + $0xf40] sm:$0xff] }
 0x121   :  { %1121 = vmatprep.subr.mxu0 %v900_v8  ;;  %1192 = vmatprep.subr.mxu1 %v902_v9  ;;  %v996_v8 = vld [vmem:[#allocation10 + $0xf08] sm:$0xff]  ;;  %v998_v9 = vld [vmem:[#allocation10 + $0xf18] sm:$0xff] }
 0x122   :  { %1122 = vmatpush1.msra.mxu0 %v899_v10  ;;  %1193 = vmatpush1.msra.mxu1 %v901_v11  ;;  %v995_v10 = vld [vmem:[#allocation10 + $0xf00] sm:$0xff]  ;;  %v1956_v11 = vld [vmem:[#allocation7 + $0x8] sm:$0xff] }
 0x123   :  { %1123 = vmatprep.subr.mxu0 %v1086_v12  ;;  %1194 = vmatprep.subr.mxu1 %v1088_v13  ;;  %v997_v12 = vld [vmem:[#allocation10 + $0xf10] sm:$0xff]  ;;  %v1958_v13 = vld [vmem:[#allocation7] sm:$0xff] }
 0x124   :  { %1124 = vmatpush2.msra.mxu0 %v1085_v14  ;;  %1195 = vmatpush2.msra.mxu1 %v1087_v15  ;;  %v994_v14 = vld [vmem:[#allocation10 + $0xef8] sm:$0xff] }
 0x125   :  { %1125 = vmatprep.subr.mxu0 %v1080_v63  ;;  %1196 = vmatprep.subr.mxu1 %v1082_v16  ;;  %v1404_v15 = vld [vmem:[#allocation10 + $0x14d8] sm:$0xff]  ;;  %v993_v63 = vld [vmem:[#allocation10 + $0xef0] sm:$0xff] }
 0x126   :  { %1126 = vmatpush2.msra.mxu0 %v1079_v17  ;;  %1197 = vmatpush2.msra.mxu1 %v1081_v18  ;;  %v1403_v16 = vld [vmem:[#allocation10 + $0x14d0] sm:$0xff]  ;;  %v988_v17 = vld [vmem:[#allocation10 + $0xec8] sm:$0xff] }
 0x127   :  { %1127 = vmatprep.subr.mxu0 %v1074_v19  ;;  %1198 = vmatprep.subr.mxu1 %v1076_v1  ;;  %v1398_v18 = vld [vmem:[#allocation10 + $0x14a8] sm:$0xff]  ;;  %v987_v19 = vld [vmem:[#allocation10 + $0xec0] sm:$0xff] }
 0x128   :  { %1128 = vmatpush2.msra.mxu0 %v1073_v20  ;;  %1199 = vmatpush2.msra.mxu1 %v1075_v6  ;;  %v1397_v1 = vld [vmem:[#allocation10 + $0x14a0] sm:$0xff]  ;;  %v982_v20 = vld [vmem:[#allocation10 + $0xe98] sm:$0xff] }
 0x129   :  { %1129 = vmatprep.subr.mxu0 %v1068_v21  ;;  %1200 = vmatprep.subr.mxu1 %v1070_v22  ;;  %v1392_v6 = vld [vmem:[#allocation10 + $0x1478] sm:$0xff]  ;;  %v981_v21 = vld [vmem:[#allocation10 + $0xe90] sm:$0xff] }
 0x12a   :  { %1130 = vmatpush2.msra.mxu0 %v1067_v7  ;;  %1201 = vmatpush2.msra.mxu1 %v1069_v23  ;;  %v1391_v22 = vld [vmem:[#allocation10 + $0x1470] sm:$0xff]  ;;  %v976_v7 = vld [vmem:[#allocation10 + $0xe68] sm:$0xff] }
 0x12b   :  { %1131 = vmatprep.subr.mxu0 %v1062_v24  ;;  %1202 = vmatprep.subr.mxu1 %v1064_v25  ;;  %v1386_v23 = vld [vmem:[#allocation10 + $0x1448] sm:$0xff]  ;;  %v975_v24 = vld [vmem:[#allocation10 + $0xe60] sm:$0xff] }
 0x12c   :  { %1132 = vmatpush2.msra.mxu0 %v1061_v26  ;;  %1203 = vmatpush2.msra.mxu1 %v1063_v27  ;;  %v1385_v25 = vld [vmem:[#allocation10 + $0x1440] sm:$0xff]  ;;  %v970_v26 = vld [vmem:[#allocation10 + $0xe38] sm:$0xff] }
 0x12d   :  { %1133 = vmatprep.subr.mxu0 %v1056_v28  ;;  %1204 = vmatprep.subr.mxu1 %v1058_v29  ;;  %v1380_v27 = vld [vmem:[#allocation10 + $0x1418] sm:$0xff]  ;;  %v969_v28 = vld [vmem:[#allocation10 + $0xe30] sm:$0xff] }
 0x12e   :  { %1134 = vmatpush2.msra.mxu0 %v1055_v30  ;;  %1205 = vmatpush2.msra.mxu1 %v1057_v31  ;;  %v1379_v29 = vld [vmem:[#allocation10 + $0x1410] sm:$0xff]  ;;  %v964_v30 = vld [vmem:[#allocation10 + $0xe08] sm:$0xff] }
 0x12f   :  { %1135 = vmatprep.subr.mxu0 %v1050_v32  ;;  %1206 = vmatprep.subr.mxu1 %v1052_v33  ;;  %v1374_v31 = vld [vmem:[#allocation10 + $0x13e8] sm:$0xff]  ;;  %v963_v32 = vld [vmem:[#allocation10 + $0xe00] sm:$0xff] }
 0x130   :  { %1136 = vmatpush2.msra.mxu0 %v1049_v34  ;;  %1207 = vmatpush2.msra.mxu1 %v1051_v35  ;;  %v1373_v33 = vld [vmem:[#allocation10 + $0x13e0] sm:$0xff]  ;;  %v958_v34 = vld [vmem:[#allocation10 + $0xdd8] sm:$0xff] }
 0x131   :  { %1137 = vmatprep.subr.mxu0 %v1044_v36  ;;  %1208 = vmatprep.subr.mxu1 %v1046_v37  ;;  %v1368_v35 = vld [vmem:[#allocation10 + $0x13b8] sm:$0xff]  ;;  %v957_v36 = vld [vmem:[#allocation10 + $0xdd0] sm:$0xff] }
 0x132   :  { %1138 = vmatpush2.msra.mxu0 %v1043_v38  ;;  %1209 = vmatpush2.msra.mxu1 %v1045_v39  ;;  %v1367_v37 = vld [vmem:[#allocation10 + $0x13b0] sm:$0xff]  ;;  %v952_v38 = vld [vmem:[#allocation10 + $0xda8] sm:$0xff] }
 0x133   :  { %1139 = vmatprep.subr.mxu0 %v1038_v40  ;;  %1210 = vmatprep.subr.mxu1 %v1040_v41  ;;  %v1362_v39 = vld [vmem:[#allocation10 + $0x1388] sm:$0xff]  ;;  %v951_v40 = vld [vmem:[#allocation10 + $0xda0] sm:$0xff] }
 0x134   :  { %1140 = vmatpush2.msra.mxu0 %v1037_v42  ;;  %1211 = vmatpush2.msra.mxu1 %v1039_v43  ;;  %v1361_v41 = vld [vmem:[#allocation10 + $0x1380] sm:$0xff]  ;;  %v946_v42 = vld [vmem:[#allocation10 + $0xd78] sm:$0xff] }
 0x135   :  { %1141 = vmatprep.subr.mxu0 %v1032_v44  ;;  %1212 = vmatprep.subr.mxu1 %v1034_v45  ;;  %v1356_v43 = vld [vmem:[#allocation10 + $0x1358] sm:$0xff]  ;;  %v945_v44 = vld [vmem:[#allocation10 + $0xd70] sm:$0xff] }
 0x136   :  { %1142 = vmatpush2.msra.mxu0 %v1031_v46  ;;  %1213 = vmatpush2.msra.mxu1 %v1033_v47  ;;  %v1355_v45 = vld [vmem:[#allocation10 + $0x1350] sm:$0xff]  ;;  %v940_v46 = vld [vmem:[#allocation10 + $0xd48] sm:$0xff] }
 0x137   :  { %1143 = vmatprep.subr.mxu0 %v1026_v48  ;;  %1214 = vmatprep.subr.mxu1 %v1028_v49  ;;  %v1350_v47 = vld [vmem:[#allocation10 + $0x1328] sm:$0xff]  ;;  %v939_v48 = vld [vmem:[#allocation10 + $0xd40] sm:$0xff] }
 0x138   :  { %1144 = vmatpush2.msra.mxu0 %v1025_v50  ;;  %1215 = vmatpush2.msra.mxu1 %v1027_v51  ;;  %v1349_v49 = vld [vmem:[#allocation10 + $0x1320] sm:$0xff]  ;;  %v934_v50 = vld [vmem:[#allocation10 + $0xd18] sm:$0xff] }
 0x139   :  { %1145 = vmatprep.subr.mxu0 %v1020_v52  ;;  %1216 = vmatprep.subr.mxu1 %v1022_v53  ;;  %v1344_v51 = vld [vmem:[#allocation10 + $0x12f8] sm:$0xff]  ;;  %v933_v52 = vld [vmem:[#allocation10 + $0xd10] sm:$0xff] }
 0x13a   :  { %1146 = vmatpush2.msra.mxu0 %v1019_v54  ;;  %1217 = vmatpush2.msra.mxu1 %v1021_v55  ;;  %v1343_v53 = vld [vmem:[#allocation10 + $0x12f0] sm:$0xff]  ;;  %v928_v54 = vld [vmem:[#allocation10 + $0xce8] sm:$0xff] }
 0x13b   :  { %1147 = vmatprep.subr.mxu0 %v1014_v56  ;;  %1218 = vmatprep.subr.mxu1 %v1016_v57  ;;  %v1338_v55 = vld [vmem:[#allocation10 + $0x12c8] sm:$0xff]  ;;  %v927_v56 = vld [vmem:[#allocation10 + $0xce0] sm:$0xff] }
 0x13c   :  { %1148 = vmatpush2.msra.mxu0 %v1013_v58  ;;  %1219 = vmatpush2.msra.mxu1 %v1015_v59  ;;  %v1337_v57 = vld [vmem:[#allocation10 + $0x12c0] sm:$0xff]  ;;  %v922_v58 = vld [vmem:[#allocation10 + $0xcb8] sm:$0xff] }
 0x13d   :  { %1149 = vmatprep.subr.mxu0 %v1008_v60  ;;  %1220 = vmatprep.subr.mxu1 %v1010_v61  ;;  %v1332_v59 = vld [vmem:[#allocation10 + $0x1298] sm:$0xff]  ;;  %v921_v60 = vld [vmem:[#allocation10 + $0xcb0] sm:$0xff] }
 0x13e   :  { %1150 = vmatpush2.msra.mxu0 %v1007_v62  ;;  %1221 = vmatpush2.msra.mxu1 %v1009_v0  ;;  %v1331_v61 = vld [vmem:[#allocation10 + $0x1290] sm:$0xff]  ;;  %v916_v62 = vld [vmem:[#allocation10 + $0xc88] sm:$0xff] }
 0x13f   :  { %1151 = vmatprep.subr.mxu0 %v1002_v2  ;;  %1222 = vmatprep.subr.mxu1 %v1004_v3  ;;  %v1326_v0 = vld [vmem:[#allocation10 + $0x1268] sm:$0xff]  ;;  %v915_v2 = vld [vmem:[#allocation10 + $0xc80] sm:$0xff] }
 0x140   :  { %1152 = vmatpush2.msra.mxu0 %v1001_v4  ;;  %1223 = vmatpush2.msra.mxu1 %v1003_v5  ;;  %v1325_v3 = vld [vmem:[#allocation10 + $0x1260] sm:$0xff]  ;;  %v910_v4 = vld [vmem:[#allocation10 + $0xc58] sm:$0xff] }
 0x141   :  { %1153 = vmatprep.subr.mxu0 %v996_v8  ;;  %1224 = vmatprep.subr.mxu1 %v998_v9  ;;  %v1320_v5 = vld [vmem:[#allocation10 + $0x1238] sm:$0xff]  ;;  %v909_v8 = vld [vmem:[#allocation10 + $0xc50] sm:$0xff] }
 0x142   :  { %1154 = vmatpush2.msra.mxu0 %v995_v10  ;;  %1155 = vmatprep.mubr.f32.mxu0 %v1956_v11  ;;  %v1319_v9 = vld [vmem:[#allocation10 + $0x1230] sm:$0xff]  ;;  %v904_v10 = vld [vmem:[#allocation10 + $0xc28] sm:$0xff] }
 0x143   :  { %1225 = vmatpush2.msra.mxu1 %v997_v12  ;;  %1226 = vmatprep.mubr.f32.mxu1 %v1956_v11  ;;  %v1314_v12 = vld [vmem:[#allocation10 + $0x1208] sm:$0xff] }
 0x144   :  { %1156 = vmatmul.mubr.f32.vlgmr.msra.gmra.mxu0 %v1958_v13  ;;  %1227 = vmatmul.mubr.f32.vlgmr.msra.gmra.mxu1 %v1958_v13 }
 0x145   :  { %1233 = vmatprep.subr.mxu0 %v994_v14  ;;  %1505 = vmatprep.subr.mxu1 %v1404_v15  ;;  %v903_v14 = vld [vmem:[#allocation10 + $0xc20] sm:$0xff] }
 0x146   :  { %1234 = vmatpush1.msra.mxu0 %v993_v63  ;;  %1506 = vmatpush1.msra.mxu1 %v1403_v16  ;;  %v1313_v15 = vld [vmem:[#allocation10 + $0x1200] sm:$0xff]  ;;  %v1090_v63 = vld [vmem:[#allocation10 + $0x11f8] sm:$0xff] }
 0x147   :  { %1235 = vmatprep.subr.mxu0 %v988_v17  ;;  %1507 = vmatprep.subr.mxu1 %v1398_v18  ;;  %v1500_v16 = vld [vmem:[#allocation10 + $0x17d8] sm:$0xff]  ;;  %v1089_v17 = vld [vmem:[#allocation10 + $0x11f0] sm:$0xff] }
 0x148   :  { %1236 = vmatpush1.msra.mxu0 %v987_v19  ;;  %1508 = vmatpush1.msra.mxu1 %v1397_v1  ;;  %v1499_v18 = vld [vmem:[#allocation10 + $0x17d0] sm:$0xff]  ;;  %v1084_v19 = vld [vmem:[#allocation10 + $0x11c8] sm:$0xff] }
 0x149   :  { %1237 = vmatprep.subr.mxu0 %v982_v20  ;;  %1509 = vmatprep.subr.mxu1 %v1392_v6  ;;  %v1494_v1 = vld [vmem:[#allocation10 + $0x17a8] sm:$0xff]  ;;  %v1083_v20 = vld [vmem:[#allocation10 + $0x11c0] sm:$0xff] }
 0x14a   :  { %1238 = vmatpush1.msra.mxu0 %v981_v21  ;;  %1510 = vmatpush1.msra.mxu1 %v1391_v22  ;;  %v1493_v6 = vld [vmem:[#allocation10 + $0x17a0] sm:$0xff]  ;;  %v1078_v21 = vld [vmem:[#allocation10 + $0x1198] sm:$0xff] }
 0x14b   :  { %1239 = vmatprep.subr.mxu0 %v976_v7  ;;  %1511 = vmatprep.subr.mxu1 %v1386_v23  ;;  %v1488_v22 = vld [vmem:[#allocation10 + $0x1778] sm:$0xff]  ;;  %v1077_v7 = vld [vmem:[#allocation10 + $0x1190] sm:$0xff] }
 0x14c   :  { %1240 = vmatpush1.msra.mxu0 %v975_v24  ;;  %1512 = vmatpush1.msra.mxu1 %v1385_v25  ;;  %v1487_v23 = vld [vmem:[#allocation10 + $0x1770] sm:$0xff]  ;;  %v1072_v24 = vld [vmem:[#allocation10 + $0x1168] sm:$0xff] }
 0x14d   :  { %1241 = vmatprep.subr.mxu0 %v970_v26  ;;  %1513 = vmatprep.subr.mxu1 %v1380_v27  ;;  %v1482_v25 = vld [vmem:[#allocation10 + $0x1748] sm:$0xff]  ;;  %v1071_v26 = vld [vmem:[#allocation10 + $0x1160] sm:$0xff] }
 0x14e   :  { %1242 = vmatpush1.msra.mxu0 %v969_v28  ;;  %1514 = vmatpush1.msra.mxu1 %v1379_v29  ;;  %v1481_v27 = vld [vmem:[#allocation10 + $0x1740] sm:$0xff]  ;;  %v1066_v28 = vld [vmem:[#allocation10 + $0x1138] sm:$0xff] }
 0x14f   :  { %1243 = vmatprep.subr.mxu0 %v964_v30  ;;  %1515 = vmatprep.subr.mxu1 %v1374_v31  ;;  %v1476_v29 = vld [vmem:[#allocation10 + $0x1718] sm:$0xff]  ;;  %v1065_v30 = vld [vmem:[#allocation10 + $0x1130] sm:$0xff] }
 0x150   :  { %1244 = vmatpush1.msra.mxu0 %v963_v32  ;;  %1516 = vmatpush1.msra.mxu1 %v1373_v33  ;;  %v1475_v31 = vld [vmem:[#allocation10 + $0x1710] sm:$0xff]  ;;  %v1060_v32 = vld [vmem:[#allocation10 + $0x1108] sm:$0xff] }
 0x151   :  { %1245 = vmatprep.subr.mxu0 %v958_v34  ;;  %1517 = vmatprep.subr.mxu1 %v1368_v35  ;;  %v1470_v33 = vld [vmem:[#allocation10 + $0x16e8] sm:$0xff]  ;;  %v1059_v34 = vld [vmem:[#allocation10 + $0x1100] sm:$0xff] }
 0x152   :  { %1246 = vmatpush1.msra.mxu0 %v957_v36  ;;  %1518 = vmatpush1.msra.mxu1 %v1367_v37  ;;  %v1469_v35 = vld [vmem:[#allocation10 + $0x16e0] sm:$0xff]  ;;  %v1054_v36 = vld [vmem:[#allocation10 + $0x10d8] sm:$0xff] }
 0x153   :  { %1247 = vmatprep.subr.mxu0 %v952_v38  ;;  %1519 = vmatprep.subr.mxu1 %v1362_v39  ;;  %v1464_v37 = vld [vmem:[#allocation10 + $0x16b8] sm:$0xff]  ;;  %v1053_v38 = vld [vmem:[#allocation10 + $0x10d0] sm:$0xff] }
 0x154   :  { %1248 = vmatpush1.msra.mxu0 %v951_v40  ;;  %1520 = vmatpush1.msra.mxu1 %v1361_v41  ;;  %v1463_v39 = vld [vmem:[#allocation10 + $0x16b0] sm:$0xff]  ;;  %v1048_v40 = vld [vmem:[#allocation10 + $0x10a8] sm:$0xff] }
 0x155   :  { %1249 = vmatprep.subr.mxu0 %v946_v42  ;;  %1521 = vmatprep.subr.mxu1 %v1356_v43  ;;  %v1458_v41 = vld [vmem:[#allocation10 + $0x1688] sm:$0xff]  ;;  %v1047_v42 = vld [vmem:[#allocation10 + $0x10a0] sm:$0xff] }
 0x156   :  { %1250 = vmatpush1.msra.mxu0 %v945_v44  ;;  %1522 = vmatpush1.msra.mxu1 %v1355_v45  ;;  %v1457_v43 = vld [vmem:[#allocation10 + $0x1680] sm:$0xff]  ;;  %v1042_v44 = vld [vmem:[#allocation10 + $0x1078] sm:$0xff] }
 0x157   :  { %1251 = vmatprep.subr.mxu0 %v940_v46  ;;  %1523 = vmatprep.subr.mxu1 %v1350_v47  ;;  %v1452_v45 = vld [vmem:[#allocation10 + $0x1658] sm:$0xff]  ;;  %v1041_v46 = vld [vmem:[#allocation10 + $0x1070] sm:$0xff] }
 0x158   :  { %1252 = vmatpush1.msra.mxu0 %v939_v48  ;;  %1524 = vmatpush1.msra.mxu1 %v1349_v49  ;;  %v1451_v47 = vld [vmem:[#allocation10 + $0x1650] sm:$0xff]  ;;  %v1036_v48 = vld [vmem:[#allocation10 + $0x1048] sm:$0xff] }
 0x159   :  { %1253 = vmatprep.subr.mxu0 %v934_v50  ;;  %1525 = vmatprep.subr.mxu1 %v1344_v51  ;;  %v1446_v49 = vld [vmem:[#allocation10 + $0x1628] sm:$0xff]  ;;  %v1035_v50 = vld [vmem:[#allocation10 + $0x1040] sm:$0xff] }
 0x15a   :  { %1254 = vmatpush1.msra.mxu0 %v933_v52  ;;  %1526 = vmatpush1.msra.mxu1 %v1343_v53  ;;  %v1445_v51 = vld [vmem:[#allocation10 + $0x1620] sm:$0xff]  ;;  %v1030_v52 = vld [vmem:[#allocation10 + $0x1018] sm:$0xff] }
 0x15b   :  { %1255 = vmatprep.subr.mxu0 %v928_v54  ;;  %1527 = vmatprep.subr.mxu1 %v1338_v55  ;;  %v1440_v53 = vld [vmem:[#allocation10 + $0x15f8] sm:$0xff]  ;;  %v1029_v54 = vld [vmem:[#allocation10 + $0x1010] sm:$0xff] }
 0x15c   :  { %1256 = vmatpush1.msra.mxu0 %v927_v56  ;;  %1528 = vmatpush1.msra.mxu1 %v1337_v57  ;;  %v1439_v55 = vld [vmem:[#allocation10 + $0x15f0] sm:$0xff]  ;;  %v1024_v56 = vld [vmem:[#allocation10 + $0xfe8] sm:$0xff] }
 0x15d   :  { %1257 = vmatprep.subr.mxu0 %v922_v58  ;;  %1529 = vmatprep.subr.mxu1 %v1332_v59  ;;  %v1434_v57 = vld [vmem:[#allocation10 + $0x15c8] sm:$0xff]  ;;  %v1023_v58 = vld [vmem:[#allocation10 + $0xfe0] sm:$0xff] }
 0x15e   :  { %1258 = vmatpush1.msra.mxu0 %v921_v60  ;;  %1530 = vmatpush1.msra.mxu1 %v1331_v61  ;;  %v1433_v59 = vld [vmem:[#allocation10 + $0x15c0] sm:$0xff]  ;;  %v1018_v60 = vld [vmem:[#allocation10 + $0xfb8] sm:$0xff] }
 0x15f   :  { %1259 = vmatprep.subr.mxu0 %v916_v62  ;;  %1531 = vmatprep.subr.mxu1 %v1326_v0  ;;  %v1428_v61 = vld [vmem:[#allocation10 + $0x1598] sm:$0xff]  ;;  %v1017_v62 = vld [vmem:[#allocation10 + $0xfb0] sm:$0xff] }
 0x160   :  { %1260 = vmatpush1.msra.mxu0 %v915_v2  ;;  %1532 = vmatpush1.msra.mxu1 %v1325_v3  ;;  %v1427_v0 = vld [vmem:[#allocation10 + $0x1590] sm:$0xff]  ;;  %v1012_v2 = vld [vmem:[#allocation10 + $0xf88] sm:$0xff] }
 0x161   :  { %1261 = vmatprep.subr.mxu0 %v910_v4  ;;  %1533 = vmatprep.subr.mxu1 %v1320_v5  ;;  %v1422_v3 = vld [vmem:[#allocation10 + $0x1568] sm:$0xff]  ;;  %v1011_v4 = vld [vmem:[#allocation10 + $0xf80] sm:$0xff] }
 0x162   :  { %1262 = vmatpush1.msra.mxu0 %v909_v8  ;;  %1534 = vmatpush1.msra.mxu1 %v1319_v9  ;;  %v1421_v5 = vld [vmem:[#allocation10 + $0x1560] sm:$0xff]  ;;  %v1006_v8 = vld [vmem:[#allocation10 + $0xf58] sm:$0xff] }
 0x163   :  { %1263 = vmatprep.subr.mxu0 %v904_v10  ;;  %1535 = vmatprep.subr.mxu1 %v1314_v12  ;;  %v1416_v9 = vld [vmem:[#allocation10 + $0x1538] sm:$0xff]  ;;  %v1005_v10 = vld [vmem:[#allocation10 + $0xf50] sm:$0xff] }
 0x164   :  { %1264 = vmatpush1.msra.mxu0 %v903_v14  ;;  %1536 = vmatpush1.msra.mxu1 %v1313_v15  ;;  %v1415_v12 = vld [vmem:[#allocation10 + $0x1530] sm:$0xff]  ;;  %v1000_v14 = vld [vmem:[#allocation10 + $0xf28] sm:$0xff] }
 0x165   :  { %1265 = vmatprep.subr.mxu0 %v1090_v63  ;;  %1537 = vmatprep.subr.mxu1 %v1500_v16  ;;  %v1410_v15 = vld [vmem:[#allocation10 + $0x1508] sm:$0xff]  ;;  %v999_v63 = vld [vmem:[#allocation10 + $0xf20] sm:$0xff] }
 0x166   :  { %1266 = vmatpush2.msra.mxu0 %v1089_v17  ;;  %1538 = vmatpush2.msra.mxu1 %v1499_v18  ;;  %v1409_v16 = vld [vmem:[#allocation10 + $0x1500] sm:$0xff]  ;;  %v1964_v17 = vld [vmem:[#allocation8 + $0x8] sm:$0xff]  ;;  %v1966_v18 = vld [vmem:[#allocation8] sm:$0xff] }
 0x167   :  { %1267 = vmatprep.subr.mxu0 %v1084_v19  ;;  %1539 = vmatprep.subr.mxu1 %v1494_v1  ;;  %v1406_v19 = vld [vmem:[#allocation10 + $0x14e8] sm:$0xff]  ;;  %v1408_v1 = vld [vmem:[#allocation10 + $0x14f8] sm:$0xff] }
 0x168   :  { %1268 = vmatpush2.msra.mxu0 %v1083_v20  ;;  %1540 = vmatpush2.msra.mxu1 %v1493_v6  ;;  %v1405_v20 = vld [vmem:[#allocation10 + $0x14e0] sm:$0xff]  ;;  %v1407_v6 = vld [vmem:[#allocation10 + $0x14f0] sm:$0xff] }
 0x169   :  { %1269 = vmatprep.subr.mxu0 %v1078_v21  ;;  %1541 = vmatprep.subr.mxu1 %v1488_v22  ;;  %v1400_v21 = vld [vmem:[#allocation10 + $0x14b8] sm:$0xff]  ;;  %v1402_v22 = vld [vmem:[#allocation10 + $0x14c8] sm:$0xff] }
 0x16a   :  { %1270 = vmatpush2.msra.mxu0 %v1077_v7  ;;  %1542 = vmatpush2.msra.mxu1 %v1487_v23  ;;  %v1399_v7 = vld [vmem:[#allocation10 + $0x14b0] sm:$0xff]  ;;  %v1401_v23 = vld [vmem:[#allocation10 + $0x14c0] sm:$0xff] }
 0x16b   :  { %1271 = vmatprep.subr.mxu0 %v1072_v24  ;;  %1543 = vmatprep.subr.mxu1 %v1482_v25  ;;  %v1396_v24 = vld [vmem:[#allocation10 + $0x1498] sm:$0xff]  ;;  %v1393_v25 = vld [vmem:[#allocation10 + $0x1480] sm:$0xff] }
 0x16c   :  { %1272 = vmatpush2.msra.mxu0 %v1071_v26  ;;  %1544 = vmatpush2.msra.mxu1 %v1481_v27  ;;  %v1395_v26 = vld [vmem:[#allocation10 + $0x1490] sm:$0xff]  ;;  %v1388_v27 = vld [vmem:[#allocation10 + $0x1458] sm:$0xff] }
 0x16d   :  { %1273 = vmatprep.subr.mxu0 %v1066_v28  ;;  %1545 = vmatprep.subr.mxu1 %v1476_v29  ;;  %v1387_v28 = vld [vmem:[#allocation10 + $0x1450] sm:$0xff]  ;;  %v1389_v29 = vld [vmem:[#allocation10 + $0x1460] sm:$0xff] }
 0x16e   :  { %1274 = vmatpush2.msra.mxu0 %v1065_v30  ;;  %1546 = vmatpush2.msra.mxu1 %v1475_v31  ;;  %v1382_v30 = vld [vmem:[#allocation10 + $0x1428] sm:$0xff]  ;;  %v1384_v31 = vld [vmem:[#allocation10 + $0x1438] sm:$0xff] }
 0x16f   :  { %1275 = vmatprep.subr.mxu0 %v1060_v32  ;;  %1547 = vmatprep.subr.mxu1 %v1470_v33  ;;  %v1381_v32 = vld [vmem:[#allocation10 + $0x1420] sm:$0xff]  ;;  %v1383_v33 = vld [vmem:[#allocation10 + $0x1430] sm:$0xff] }
 0x170   :  { %1276 = vmatpush2.msra.mxu0 %v1059_v34  ;;  %1548 = vmatpush2.msra.mxu1 %v1469_v35  ;;  %v1376_v34 = vld [vmem:[#allocation10 + $0x13f8] sm:$0xff]  ;;  %v1378_v35 = vld [vmem:[#allocation10 + $0x1408] sm:$0xff] }
 0x171   :  { %1277 = vmatprep.subr.mxu0 %v1054_v36  ;;  %1549 = vmatprep.subr.mxu1 %v1464_v37  ;;  %v1375_v36 = vld [vmem:[#allocation10 + $0x13f0] sm:$0xff]  ;;  %v1377_v37 = vld [vmem:[#allocation10 + $0x1400] sm:$0xff] }
 0x172   :  { %1278 = vmatpush2.msra.mxu0 %v1053_v38  ;;  %1550 = vmatpush2.msra.mxu1 %v1463_v39  ;;  %v1370_v38 = vld [vmem:[#allocation10 + $0x13c8] sm:$0xff]  ;;  %v1372_v39 = vld [vmem:[#allocation10 + $0x13d8] sm:$0xff] }
 0x173   :  { %1279 = vmatprep.subr.mxu0 %v1048_v40  ;;  %1551 = vmatprep.subr.mxu1 %v1458_v41  ;;  %v1369_v40 = vld [vmem:[#allocation10 + $0x13c0] sm:$0xff]  ;;  %v1371_v41 = vld [vmem:[#allocation10 + $0x13d0] sm:$0xff] }
 0x174   :  { %1280 = vmatpush2.msra.mxu0 %v1047_v42  ;;  %1552 = vmatpush2.msra.mxu1 %v1457_v43  ;;  %v1364_v42 = vld [vmem:[#allocation10 + $0x1398] sm:$0xff]  ;;  %v1366_v43 = vld [vmem:[#allocation10 + $0x13a8] sm:$0xff] }
 0x175   :  { %1281 = vmatprep.subr.mxu0 %v1042_v44  ;;  %1553 = vmatprep.subr.mxu1 %v1452_v45  ;;  %v1363_v44 = vld [vmem:[#allocation10 + $0x1390] sm:$0xff]  ;;  %v1365_v45 = vld [vmem:[#allocation10 + $0x13a0] sm:$0xff] }
 0x176   :  { %1282 = vmatpush2.msra.mxu0 %v1041_v46  ;;  %1554 = vmatpush2.msra.mxu1 %v1451_v47  ;;  %v1358_v46 = vld [vmem:[#allocation10 + $0x1368] sm:$0xff]  ;;  %v1360_v47 = vld [vmem:[#allocation10 + $0x1378] sm:$0xff] }
 0x177   :  { %1283 = vmatprep.subr.mxu0 %v1036_v48  ;;  %1555 = vmatprep.subr.mxu1 %v1446_v49  ;;  %v1357_v48 = vld [vmem:[#allocation10 + $0x1360] sm:$0xff]  ;;  %v1359_v49 = vld [vmem:[#allocation10 + $0x1370] sm:$0xff] }
 0x178   :  { %1284 = vmatpush2.msra.mxu0 %v1035_v50  ;;  %1556 = vmatpush2.msra.mxu1 %v1445_v51  ;;  %v1352_v50 = vld [vmem:[#allocation10 + $0x1338] sm:$0xff]  ;;  %v1354_v51 = vld [vmem:[#allocation10 + $0x1348] sm:$0xff] }
 0x179   :  { %1285 = vmatprep.subr.mxu0 %v1030_v52  ;;  %1557 = vmatprep.subr.mxu1 %v1440_v53  ;;  %v1351_v52 = vld [vmem:[#allocation10 + $0x1330] sm:$0xff]  ;;  %v1353_v53 = vld [vmem:[#allocation10 + $0x1340] sm:$0xff] }
 0x17a   :  { %1286 = vmatpush2.msra.mxu0 %v1029_v54  ;;  %1558 = vmatpush2.msra.mxu1 %v1439_v55  ;;  %v1346_v54 = vld [vmem:[#allocation10 + $0x1308] sm:$0xff]  ;;  %v1348_v55 = vld [vmem:[#allocation10 + $0x1318] sm:$0xff] }
 0x17b   :  { %1287 = vmatprep.subr.mxu0 %v1024_v56  ;;  %1559 = vmatprep.subr.mxu1 %v1434_v57  ;;  %v1345_v56 = vld [vmem:[#allocation10 + $0x1300] sm:$0xff]  ;;  %v1347_v57 = vld [vmem:[#allocation10 + $0x1310] sm:$0xff] }
 0x17c   :  { %1288 = vmatpush2.msra.mxu0 %v1023_v58  ;;  %1560 = vmatpush2.msra.mxu1 %v1433_v59  ;;  %v1340_v58 = vld [vmem:[#allocation10 + $0x12d8] sm:$0xff]  ;;  %v1342_v59 = vld [vmem:[#allocation10 + $0x12e8] sm:$0xff] }
 0x17d   :  { %1289 = vmatprep.subr.mxu0 %v1018_v60  ;;  %1561 = vmatprep.subr.mxu1 %v1428_v61  ;;  %v1339_v60 = vld [vmem:[#allocation10 + $0x12d0] sm:$0xff]  ;;  %v1341_v61 = vld [vmem:[#allocation10 + $0x12e0] sm:$0xff] }
 0x17e   :  { %1290 = vmatpush2.msra.mxu0 %v1017_v62  ;;  %1562 = vmatpush2.msra.mxu1 %v1427_v0  ;;  %v1334_v62 = vld [vmem:[#allocation10 + $0x12a8] sm:$0xff]  ;;  %v1336_v0 = vld [vmem:[#allocation10 + $0x12b8] sm:$0xff] }
 0x17f   :  { %1291 = vmatprep.subr.mxu0 %v1012_v2  ;;  %1563 = vmatprep.subr.mxu1 %v1422_v3  ;;  %v1333_v2 = vld [vmem:[#allocation10 + $0x12a0] sm:$0xff]  ;;  %v1335_v3 = vld [vmem:[#allocation10 + $0x12b0] sm:$0xff] }
 0x180   :  { %1292 = vmatpush2.msra.mxu0 %v1011_v4  ;;  %1564 = vmatpush2.msra.mxu1 %v1421_v5  ;;  %v1328_v4 = vld [vmem:[#allocation10 + $0x1278] sm:$0xff]  ;;  %v1330_v5 = vld [vmem:[#allocation10 + $0x1288] sm:$0xff] }
 0x181   :  { %1293 = vmatprep.subr.mxu0 %v1006_v8  ;;  %1565 = vmatprep.subr.mxu1 %v1416_v9  ;;  %v1327_v8 = vld [vmem:[#allocation10 + $0x1270] sm:$0xff]  ;;  %v1329_v9 = vld [vmem:[#allocation10 + $0x1280] sm:$0xff] }
 0x182   :  { %1294 = vmatpush2.msra.mxu0 %v1005_v10  ;;  %1566 = vmatpush2.msra.mxu1 %v1415_v12  ;;  %v1322_v10 = vld [vmem:[#allocation10 + $0x1248] sm:$0xff]  ;;  %v1324_v12 = vld [vmem:[#allocation10 + $0x1258] sm:$0xff] }
 0x183   :  { %1295 = vmatprep.subr.mxu0 %v1000_v14  ;;  %1567 = vmatprep.subr.mxu1 %v1410_v15  ;;  %v1321_v14 = vld [vmem:[#allocation10 + $0x1240] sm:$0xff]  ;;  %v1323_v15 = vld [vmem:[#allocation10 + $0x1250] sm:$0xff] }
 0x184   :  { %1296 = vmatpush2.msra.mxu0 %v999_v63  ;;  %1297 = vmatprep.mubr.f32.mxu0 %v1956_v11  ;;  %v1394_v11 = vld [vmem:[#allocation10 + $0x1488] sm:$0xff]  ;;  %v1316_v63 = vld [vmem:[#allocation10 + $0x1218] sm:$0xff] }
 0x185   :  { %1568 = vmatpush2.msra.mxu1 %v1409_v16  ;;  %1569 = vmatprep.mubr.f32.mxu1 %v1964_v17  ;;  %v1318_v16 = vld [vmem:[#allocation10 + $0x1228] sm:$0xff] }
 0x186   :  { %1298 = vmatmul.mubr.f32.vlgmr.msra.gmra.mxu0 %v1958_v13  ;;  %1570 = vmatmul.mubr.f32.vlgmr.msra.gmra.mxu1 %v1966_v18  ;;  %v1390_v13 = vld [vmem:[#allocation10 + $0x1468] sm:$0xff] }
 0x187   :  { %1576 = vmatprep.subr.mxu0 %v1406_v19  ;;  %1647 = vmatprep.subr.mxu1 %v1408_v1  ;;  %v1315_v19 = vld [vmem:[#allocation10 + $0x1210] sm:$0xff]  ;;  %v1317_v1 = vld [vmem:[#allocation10 + $0x1220] sm:$0xff] }
 0x188   :  { %1577 = vmatpush1.msra.mxu0 %v1405_v20  ;;  %1648 = vmatpush1.msra.mxu1 %v1407_v6  ;;  %v1502_v20 = vld [vmem:[#allocation10 + $0x17e8] sm:$0xff]  ;;  %v1504_v6 = vld [vmem:[#allocation10 + $0x17f8] sm:$0xff] }
 0x189   :  { %1578 = vmatprep.subr.mxu0 %v1400_v21  ;;  %1649 = vmatprep.subr.mxu1 %v1402_v22  ;;  %v1501_v21 = vld [vmem:[#allocation10 + $0x17e0] sm:$0xff]  ;;  %v1503_v22 = vld [vmem:[#allocation10 + $0x17f0] sm:$0xff] }
 0x18a   :  { %1579 = vmatpush1.msra.mxu0 %v1399_v7  ;;  %1650 = vmatpush1.msra.mxu1 %v1401_v23  ;;  %v1496_v7 = vld [vmem:[#allocation10 + $0x17b8] sm:$0xff]  ;;  %v1498_v23 = vld [vmem:[#allocation10 + $0x17c8] sm:$0xff] }
 0x18b   :  { %1580 = vmatprep.subr.mxu0 %v1394_v11  ;;  %1651 = vmatprep.subr.mxu1 %v1396_v24  ;;  %v1495_v11 = vld [vmem:[#allocation10 + $0x17b0] sm:$0xff]  ;;  %v1497_v24 = vld [vmem:[#allocation10 + $0x17c0] sm:$0xff] }
 0x18c   :  { %1581 = vmatpush1.msra.mxu0 %v1393_v25  ;;  %1652 = vmatpush1.msra.mxu1 %v1395_v26  ;;  %v1490_v25 = vld [vmem:[#allocation10 + $0x1788] sm:$0xff]  ;;  %v1492_v26 = vld [vmem:[#allocation10 + $0x1798] sm:$0xff] }
 0x18d   :  { %1582 = vmatprep.subr.mxu0 %v1388_v27  ;;  %1653 = vmatprep.subr.mxu1 %v1390_v13  ;;  %v1489_v27 = vld [vmem:[#allocation10 + $0x1780] sm:$0xff]  ;;  %v1491_v13 = vld [vmem:[#allocation10 + $0x1790] sm:$0xff] }
 0x18e   :  { %1583 = vmatpush1.msra.mxu0 %v1387_v28  ;;  %1654 = vmatpush1.msra.mxu1 %v1389_v29  ;;  %v1484_v28 = vld [vmem:[#allocation10 + $0x1758] sm:$0xff]  ;;  %v1486_v29 = vld [vmem:[#allocation10 + $0x1768] sm:$0xff] }
 0x18f   :  { %1584 = vmatprep.subr.mxu0 %v1382_v30  ;;  %1655 = vmatprep.subr.mxu1 %v1384_v31  ;;  %v1483_v30 = vld [vmem:[#allocation10 + $0x1750] sm:$0xff]  ;;  %v1485_v31 = vld [vmem:[#allocation10 + $0x1760] sm:$0xff] }
 0x190   :  { %1585 = vmatpush1.msra.mxu0 %v1381_v32  ;;  %1656 = vmatpush1.msra.mxu1 %v1383_v33  ;;  %v1478_v32 = vld [vmem:[#allocation10 + $0x1728] sm:$0xff]  ;;  %v1480_v33 = vld [vmem:[#allocation10 + $0x1738] sm:$0xff] }
 0x191   :  { %1586 = vmatprep.subr.mxu0 %v1376_v34  ;;  %1657 = vmatprep.subr.mxu1 %v1378_v35  ;;  %v1477_v34 = vld [vmem:[#allocation10 + $0x1720] sm:$0xff]  ;;  %v1479_v35 = vld [vmem:[#allocation10 + $0x1730] sm:$0xff] }
 0x192   :  { %1587 = vmatpush1.msra.mxu0 %v1375_v36  ;;  %1658 = vmatpush1.msra.mxu1 %v1377_v37  ;;  %v1472_v36 = vld [vmem:[#allocation10 + $0x16f8] sm:$0xff]  ;;  %v1474_v37 = vld [vmem:[#allocation10 + $0x1708] sm:$0xff] }
 0x193   :  { %1588 = vmatprep.subr.mxu0 %v1370_v38  ;;  %1659 = vmatprep.subr.mxu1 %v1372_v39  ;;  %v1471_v38 = vld [vmem:[#allocation10 + $0x16f0] sm:$0xff]  ;;  %v1473_v39 = vld [vmem:[#allocation10 + $0x1700] sm:$0xff] }
 0x194   :  { %1589 = vmatpush1.msra.mxu0 %v1369_v40  ;;  %1660 = vmatpush1.msra.mxu1 %v1371_v41  ;;  %v1466_v40 = vld [vmem:[#allocation10 + $0x16c8] sm:$0xff]  ;;  %v1468_v41 = vld [vmem:[#allocation10 + $0x16d8] sm:$0xff] }
 0x195   :  { %1590 = vmatprep.subr.mxu0 %v1364_v42  ;;  %1661 = vmatprep.subr.mxu1 %v1366_v43  ;;  %v1465_v42 = vld [vmem:[#allocation10 + $0x16c0] sm:$0xff]  ;;  %v1467_v43 = vld [vmem:[#allocation10 + $0x16d0] sm:$0xff] }
 0x196   :  { %1591 = vmatpush1.msra.mxu0 %v1363_v44  ;;  %1662 = vmatpush1.msra.mxu1 %v1365_v45  ;;  %v1460_v44 = vld [vmem:[#allocation10 + $0x1698] sm:$0xff]  ;;  %v1462_v45 = vld [vmem:[#allocation10 + $0x16a8] sm:$0xff] }
 0x197   :  { %1592 = vmatprep.subr.mxu0 %v1358_v46  ;;  %1663 = vmatprep.subr.mxu1 %v1360_v47  ;;  %v1459_v46 = vld [vmem:[#allocation10 + $0x1690] sm:$0xff]  ;;  %v1461_v47 = vld [vmem:[#allocation10 + $0x16a0] sm:$0xff] }
 0x198   :  { %1593 = vmatpush1.msra.mxu0 %v1357_v48  ;;  %1664 = vmatpush1.msra.mxu1 %v1359_v49  ;;  %v1454_v48 = vld [vmem:[#allocation10 + $0x1668] sm:$0xff]  ;;  %v1456_v49 = vld [vmem:[#allocation10 + $0x1678] sm:$0xff] }
 0x199   :  { %1594 = vmatprep.subr.mxu0 %v1352_v50  ;;  %1665 = vmatprep.subr.mxu1 %v1354_v51  ;;  %v1453_v50 = vld [vmem:[#allocation10 + $0x1660] sm:$0xff]  ;;  %v1455_v51 = vld [vmem:[#allocation10 + $0x1670] sm:$0xff] }
 0x19a   :  { %1595 = vmatpush1.msra.mxu0 %v1351_v52  ;;  %1666 = vmatpush1.msra.mxu1 %v1353_v53  ;;  %v1972_v52 = vpop.f32.mrf.mxu1  ;;  %v1448_v53 = vld [vmem:[#allocation10 + $0x1638] sm:$0xff] }
 0x19b   :  { %1596 = vmatprep.subr.mxu0 %v1346_v54  ;;  %1667 = vmatprep.subr.mxu1 %v1348_v55  ;;  %v1450_v54 = vld [vmem:[#allocation10 + $0x1648] sm:$0xff]  ;;  %v1447_v55 = vld [vmem:[#allocation10 + $0x1630] sm:$0xff] }
 0x19c   :  { %1597 = vmatpush1.msra.mxu0 %v1345_v56  ;;  %1668 = vmatpush1.msra.mxu1 %v1347_v57  ;;  %v1449_v56 = vld [vmem:[#allocation10 + $0x1640] sm:$0xff]  ;;  %v1442_v57 = vld [vmem:[#allocation10 + $0x1608] sm:$0xff] }
 0x19d   :  { %1598 = vmatprep.subr.mxu0 %v1340_v58  ;;  %1669 = vmatprep.subr.mxu1 %v1342_v59  ;;  %v1444_v58 = vld [vmem:[#allocation10 + $0x1618] sm:$0xff]  ;;  %v1441_v59 = vld [vmem:[#allocation10 + $0x1600] sm:$0xff] }
 0x19e   :  { %1599 = vmatpush1.msra.mxu0 %v1339_v60  ;;  %1670 = vmatpush1.msra.mxu1 %v1341_v61  ;;  %v1443_v60 = vld [vmem:[#allocation10 + $0x1610] sm:$0xff]  ;;  %v1974_v61 = vpop.f32.mrf.mxu0 }
 0x19f   :  { %1600 = vmatprep.subr.mxu0 %v1334_v62  ;;  %1671 = vmatprep.subr.mxu1 %v1336_v0  ;;  %v1976_v62 = vpop.f32.mrf.mxu1  ;;  %v1436_v0 = vld [vmem:[#allocation10 + $0x15d8] sm:$0xff] }
 0x1a0   :  { %1601 = vmatpush1.msra.mxu0 %v1333_v2  ;;  %1672 = vmatpush1.msra.mxu1 %v1335_v3  ;;  %v1438_v2 = vld [vmem:[#allocation10 + $0x15e8] sm:$0xff]  ;;  %v1435_v3 = vld [vmem:[#allocation10 + $0x15d0] sm:$0xff] }
 0x1a1   :  { %1602 = vmatprep.subr.mxu0 %v1328_v4  ;;  %1673 = vmatprep.subr.mxu1 %v1330_v5  ;;  %v1437_v4 = vld [vmem:[#allocation10 + $0x15e0] sm:$0xff]  ;;  %v749_v5 = vpop.f32.mrf.mxu1 }
 0x1a2   :  { %1603 = vmatpush1.msra.mxu0 %v1327_v8  ;;  %1674 = vmatpush1.msra.mxu1 %v1329_v9  ;;  %v1430_v8 = vld [vmem:[#allocation10 + $0x15a8] sm:$0xff]  ;;  %v1432_v9 = vld [vmem:[#allocation10 + $0x15b8] sm:$0xff] }
 0x1a3   :  { %1604 = vmatprep.subr.mxu0 %v1322_v10  ;;  %1675 = vmatprep.subr.mxu1 %v1324_v12  ;;  %v1429_v10 = vld [vmem:[#allocation10 + $0x15a0] sm:$0xff]  ;;  %v1431_v12 = vld [vmem:[#allocation10 + $0x15b0] sm:$0xff] }
 0x1a4   :  { %1605 = vmatpush1.msra.mxu0 %v1321_v14  ;;  %1676 = vmatpush1.msra.mxu1 %v1323_v15  ;;  %v538_v14 = vpop.f32.mrf.mxu0  ;;  %v1424_v15 = vld [vmem:[#allocation10 + $0x1578] sm:$0xff] }
 0x1a5   :  { %1606 = vmatprep.subr.mxu0 %v1316_v63  ;;  %1677 = vmatprep.subr.mxu1 %v1318_v16  ;;  %v1426_v63 = vld [vmem:[#allocation10 + $0x1588] sm:$0xff]  ;;  %v1423_v16 = vld [vmem:[#allocation10 + $0x1570] sm:$0xff] }
 0x1a6   :  { %1607 = vmatpush1.msra.mxu0 %v1315_v19  ;;  %1678 = vmatpush1.msra.mxu1 %v1317_v1  ;;  %v1425_v19 = vld [vmem:[#allocation10 + $0x1580] sm:$0xff]  ;;  %v678_v1 = vpop.f32.mrf.mxu0 }
 0x1a7   :  { %1608 = vmatprep.subr.mxu0 %v1502_v20  ;;  %1679 = vmatprep.subr.mxu1 %v1504_v6  ;;  %v751_v20 = vpop.f32.mrf.mxu1  ;;  %v1418_v6 = vld [vmem:[#allocation10 + $0x1548] sm:$0xff] }
 0x1a8   :  { %1609 = vmatpush2.msra.mxu0 %v1501_v21  ;;  %1680 = vmatpush2.msra.mxu1 %v1503_v22  ;;  %v1420_v21 = vld [vmem:[#allocation10 + $0x1558] sm:$0xff]  ;;  %v1417_v22 = vld [vmem:[#allocation10 + $0x1540] sm:$0xff] }
 0x1a9   :  { %1610 = vmatprep.subr.mxu0 %v1496_v7  ;;  %1681 = vmatprep.subr.mxu1 %v1498_v23  ;;  %v1419_v7 = vld [vmem:[#allocation10 + $0x1550] sm:$0xff]  ;;  %v1412_v23 = vld [vmem:[#allocation10 + $0x1518] sm:$0xff] }
 0x1aa   :  { %1611 = vmatpush2.msra.mxu0 %v1495_v11  ;;  %1682 = vmatpush2.msra.mxu1 %v1497_v24  ;;  %v1414_v11 = vld [vmem:[#allocation10 + $0x1528] sm:$0xff] }
 0x1ab   :  { %1612 = vmatprep.subr.mxu0 %v1490_v25  ;;  %1683 = vmatprep.subr.mxu1 %v1492_v26  ;;  %v1411_v25 = vld [vmem:[#allocation10 + $0x1510] sm:$0xff]  ;;  %v680_v26 = vpop.f32.mrf.mxu0 }
 0x1ac   :  { %1613 = vmatpush2.msra.mxu0 %v1489_v27  ;;  %1684 = vmatpush2.msra.mxu1 %v1491_v13  ;;  %v1413_v27 = vld [vmem:[#allocation10 + $0x1520] sm:$0xff] }
 0x1ad   :  { %1614 = vmatprep.subr.mxu0 %v1484_v28  ;;  %1685 = vmatprep.subr.mxu1 %v1486_v29 }
 0x1ae   :  { %1615 = vmatpush2.msra.mxu0 %v1483_v30  ;;  %1686 = vmatpush2.msra.mxu1 %v1485_v31 }
 0x1af   :  { %1616 = vmatprep.subr.mxu0 %v1478_v32  ;;  %1687 = vmatprep.subr.mxu1 %v1480_v33 }
 0x1b0   :  { %1617 = vmatpush2.msra.mxu0 %v1477_v34  ;;  %1688 = vmatpush2.msra.mxu1 %v1479_v35 }
 0x1b1   :  { %1618 = vmatprep.subr.mxu0 %v1472_v36  ;;  %1689 = vmatprep.subr.mxu1 %v1474_v37 }
 0x1b2   :  { %1619 = vmatpush2.msra.mxu0 %v1471_v38  ;;  %1690 = vmatpush2.msra.mxu1 %v1473_v39  ;;  %v750_v38 = vadd.f32 %v749_v5, %v1974_v61 }
 0x1b3   :  { %1620 = vmatprep.subr.mxu0 %v1466_v40  ;;  %1691 = vmatprep.subr.mxu1 %v1468_v41  ;;  %v752_v40 = vadd.f32 %v751_v20, %v538_v14 }
 0x1b4   :  { %1621 = vmatpush2.msra.mxu0 %v1465_v42  ;;  %1692 = vmatpush2.msra.mxu1 %v1467_v43 }
 0x1b5   :  { %1622 = vmatprep.subr.mxu0 %v1460_v44  ;;  %1693 = vmatprep.subr.mxu1 %v1462_v45 }
 0x1b6   :  { %1623 = vmatpush2.msra.mxu0 %v1459_v46  ;;  %1694 = vmatpush2.msra.mxu1 %v1461_v47 }
 0x1b7   :  { %1624 = vmatprep.subr.mxu0 %v1454_v48  ;;  %1695 = vmatprep.subr.mxu1 %v1456_v49 }
 0x1b8   :  { %1625 = vmatpush2.msra.mxu0 %v1453_v50  ;;  %1696 = vmatpush2.msra.mxu1 %v1455_v51 }
 0x1b9   :  { %1626 = vmatprep.subr.mxu0 %v1448_v53  ;;  %1697 = vmatprep.subr.mxu1 %v1450_v54 }
 0x1ba   :  { %1627 = vmatpush2.msra.mxu0 %v1447_v55  ;;  %1698 = vmatpush2.msra.mxu1 %v1449_v56 }
 0x1bb   :  { %1628 = vmatprep.subr.mxu0 %v1442_v57  ;;  %1699 = vmatprep.subr.mxu1 %v1444_v58 }
 0x1bc   :  { %1629 = vmatpush2.msra.mxu0 %v1441_v59  ;;  %1700 = vmatpush2.msra.mxu1 %v1443_v60 }
 0x1bd   :  { %1630 = vmatprep.subr.mxu0 %v1436_v0  ;;  %1701 = vmatprep.subr.mxu1 %v1438_v2 }
 0x1be   :  { %1631 = vmatpush2.msra.mxu0 %v1435_v3  ;;  %1702 = vmatpush2.msra.mxu1 %v1437_v4 }
 0x1bf   :  { %1632 = vmatprep.subr.mxu0 %v1430_v8  ;;  %1703 = vmatprep.subr.mxu1 %v1432_v9 }
 0x1c0   :  { %1633 = vmatpush2.msra.mxu0 %v1429_v10  ;;  %1704 = vmatpush2.msra.mxu1 %v1431_v12 }
 0x1c1   :  { %1634 = vmatprep.subr.mxu0 %v1424_v15  ;;  %1705 = vmatprep.subr.mxu1 %v1426_v63 }
 0x1c2   :  { %1635 = vmatpush2.msra.mxu0 %v1423_v16  ;;  %1706 = vmatpush2.msra.mxu1 %v1425_v19  ;;  %v891_v24 = vpop.f32.mrf.mxu1  ;;  %v820_v29 = vpop.f32.mrf.mxu0 }
 0x1c3   :  { %1636 = vmatprep.subr.mxu0 %v1418_v6  ;;  %1707 = vmatprep.subr.mxu1 %v1420_v21  ;;  %v821_v31 = vadd.f32 %v820_v29, %v1972_v52  ;;  %v892_v46 = vadd.f32 %v891_v24, %v678_v1 }
 0x1c4   :  { %1637 = vmatpush2.msra.mxu0 %v1417_v22  ;;  %1708 = vmatpush2.msra.mxu1 %v1419_v7  ;;  %v893_v13 = vpop.f32.mrf.mxu1  ;;  %v822_v30 = vpop.f32.mrf.mxu0 }
 0x1c5   :  { %1638 = vmatprep.subr.mxu0 %v1412_v23  ;;  %1709 = vmatprep.subr.mxu1 %v1414_v11  ;;  %v894_v28 = vadd.f32 %v893_v13, %v680_v26  ;;  %v823_v33 = vadd.f32 %v822_v30, %v1976_v62 }
 0x1c6   :  { %1639 = vmatpush2.msra.mxu0 %v1411_v25  ;;  %1640 = vmatprep.mubr.f32.mxu0 %v1964_v17 }
 0x1c7   :  { %1710 = vmatpush2.msra.mxu1 %v1413_v27  ;;  %1711 = vmatprep.mubr.f32.mxu1 %v1964_v17 }
 0x1c8   :  { %1641 = vmatmul.mubr.f32.vlgmr.msra.gmra.mxu0 %v1966_v18  ;;  %1712 = vmatmul.mubr.f32.vlgmr.msra.gmra.mxu1 %v1966_v18 }
 0x204   :  { %v1228_v32 = vpop.f32.mrf.mxu1  ;;  %v1157_v37 = vpop.f32.mrf.mxu0 }
 0x205   :  { %v1306_v34 = vadd.f32 %v1228_v32, %v821_v31  ;;  %v1304_v17 = vadd.f32 %v1157_v37, %v750_v38 }
 0x206   :  { %v1230_v35 = vpop.f32.mrf.mxu1  ;;  %v1159_v39 = vpop.f32.mrf.mxu0 }
 0x207   :  { %v1307_v36 = vadd.f32 %v1230_v35, %v823_v33  ;;  %v1305_v42 = vadd.f32 %v1159_v39, %v752_v40 }
 0x246   :  { %v1571_v41 = vpop.f32.mrf.mxu1  ;;  %v1299_v45 = vpop.f32.mrf.mxu0 }
 0x247   :  { %v1718_v43 = vadd.f32 %v1571_v41, %v1304_v17  ;;  %v1308_v48 = vadd.f32 %v1299_v45, %v892_v46 }
 0x248   :  { %v1573_v18 = vpop.f32.mrf.mxu1  ;;  %v1301_v47 = vpop.f32.mrf.mxu0 }
 0x249   :  { %1724 = vst [vmem:[#allocation11] sm:$0xff] %v1718_v43  ;;  %v1719_v44 = vadd.f32 %v1573_v18, %v1305_v42  ;;  %v1309_v51 = vadd.f32 %v1301_v47, %v894_v28 }
 0x24b   :  { %1725 = vst [vmem:[#allocation11 + $0x8] sm:$0xff] %v1719_v44 }
 0x288   :  { %v1642_v49 = vpop.f32.mrf.mxu0  ;;  %v1713_v50 = vpop.f32.mrf.mxu1 }
 0x289   :  { %v1720_v52 = vadd.f32 %v1642_v49, %v1306_v34  ;;  %v1722_v53 = vadd.f32 %v1713_v50, %v1308_v48 }
 0x28a   :  { %v1644_v54 = vpop.f32.mrf.mxu0  ;;  %v1715_v55 = vpop.f32.mrf.mxu1 }
 0x28b   :  { %1726 = vst [vmem:[#allocation11 + $0x10] sm:$0xff] %v1720_v52  ;;  %1728 = vst [vmem:[#allocation11 + $0x20] sm:$0xff] %v1722_v53  ;;  %v1721_v56 = vadd.f32 %v1644_v54, %v1307_v36  ;;  %v1723_v57 = vadd.f32 %v1715_v55, %v1309_v51 }
 0x28d   :  { %1727 = vst [vmem:[#allocation11 + $0x18] sm:$0xff] %v1721_v56  ;;  %1729 = vst [vmem:[#allocation11 + $0x28] sm:$0xff] %v1723_v57 }
 0x28e   :  { %1866 = shalt.err (!%p1863_p1)
}
 0x28f   :  { %1739 = dma.vmem_to_hbm [thread:$0]  %s1737_s4, 768, %s1993_s5, [#allocation4]  }
 0x290   :  { %1881 = dma.done.wait [#allocation4], 768  }
 0x291   :  { %1882 = vsyncadd [#allocation4], 4294966528 }
 0x292   :  { %1743 = vsyncpa [#allocation3], 1 }
 0x293   :  { %1744 = vsyncpa [#allocation6], 1 }
 0x294   :  { %1745 = vsyncpa [#allocation9], 1 }
 0x295   :  { %1746 = vsyncpa [#allocation4], 1 }

</bundles_post_ra>
